<compile_context>
chip_gen: v5e
topology: v5e:2x2
jax: 0.10.0
libtpu: 0.0.40
codegen_flags: <defaults>
</compile_context>

<pallas_src>
import functools

import jax
import jax.numpy as jnp
from jax.experimental import pallas as pl
from jax.experimental.pallas import tpu as pltpu

STORE_DTYPE = jnp.bfloat16     # HBM / DMA storage dtype for activations & weights
BN_EPS = 1e-5


# ----------------------------------------------------------------------------
# Compiler-parameter helpers (generation aware)
# ----------------------------------------------------------------------------
def _vmem_limit_bytes():
    try:
        cap = pltpu.get_tpu_info().vmem_capacity_bytes
    except Exception:
        cap = 64 * 1024 * 1024          # conservative (v7x-sized) fallback
    if cap <= 64 * 1024 * 1024:
        # v7x-class part: leave headroom for Mosaic internal scratch.
        return 40 * 1024 * 1024
    return min(int(cap * 3 // 4), 100 * 1024 * 1024)   # ~96 MiB on 128-MiB parts


_VMEM_LIMIT = _vmem_limit_bytes()
_BIG_VMEM = _VMEM_LIMIT >= 90 * 1024 * 1024

# matmul tile targets: bigger on 128-MiB chips (v5e/v6e), conservative on v7x.
_TM_TARGET = 512 if _BIG_VMEM else 256
_TN_TARGET = 512 if _BIG_VMEM else 256
_TK_TARGET = 1024 if _BIG_VMEM else 512


def _cp(semantics):
    return pltpu.CompilerParams(dimension_semantics=semantics,
                                vmem_limit_bytes=_VMEM_LIMIT)


def _pick_tile(dim, target, aligns=(128,)):
    """Largest divisor of `dim` that is <= target and a multiple of one of
    `aligns` (tried in order, so e.g. 256-aligned tiles are preferred for the
    v6e 2x256^2 MXU); falls back to the full dim (full-extent blocks are
    always legal)."""
    if dim <= target:
        return dim
    for align in aligns:
        start = target - (target % align)
        for t in range(start, 0, -align):
            if dim % t == 0:
                return t
    return dim


# ----------------------------------------------------------------------------
# Pallas kernels
# ----------------------------------------------------------------------------
def _pw_kernel(*refs, act, has_gate, has_res, has_x2):
    """Tiled pointwise conv:
         Y = act(((gate*X) @ W [+ X2 @ W2]) * scale + bias) [+ residual]
    Grid = (B, M-tiles, N-tiles, K-tiles), K innermost, f32 VMEM accumulator.
    The optional second input (X2, W2) fuses the decoder skip concatenation
    (split-K over the two sources, K untiled in that mode)."""
    i = 0
    x_ref = refs[i]; i += 1
    w_ref = refs[i]; i += 1
    if has_x2:
        x2_ref = refs[i]; i += 1
        w2_ref = refs[i]; i += 1
    s_ref = refs[i]; i += 1
    b_ref = refs[i]; i += 1
    g_ref = None
    r_ref = None
    if has_gate:
        g_ref = refs[i]; i += 1
    if has_res:
        r_ref = refs[i]; i += 1
    o_ref = refs[i]
    acc_ref = refs[i + 1]

    kk = pl.program_id(3)

    @pl.when(kk == 0)
    def _():
        acc_ref[...] = jnp.zeros_like(acc_ref)

    x = x_ref[...]                       # (tm, tk) bf16
    if has_gate:
        x = x * g_ref[...]               # per-(batch, channel) SE gate, (1, tk)
    acc_ref[...] += jnp.dot(x, w_ref[...], preferred_element_type=jnp.float32)
    if has_x2:
        acc_ref[...] += jnp.dot(x2_ref[...], w2_ref[...],
                                preferred_element_type=jnp.float32)

    @pl.when(kk == pl.num_programs(3) - 1)
    def _():
        y = acc_ref[...] * s_ref[...] + b_ref[...]
        if act == "silu":
            y = y * jax.nn.sigmoid(y)
        elif act == "sigmoid":
            y = jax.nn.sigmoid(y)
        if has_res:
            y = y + r_ref[...].astype(jnp.float32)
        o_ref[...] = y.astype(o_ref.dtype)


def _dw_conv_bn_silu_kernel(x_ref, w_ref, s_ref, b_ref, o_ref, pool_ref, *,
                            k, stride, tho, wo, inv_hw):
    """Row-tiled depthwise KxK conv on a halo-padded row window (stride handled
    by strided taps) + folded BN + SiLU.  The SE global-average pool is fused
    into the epilogue: pool_ref accumulates mean(y) across the row-tile axis."""
    c = o_ref.shape[-1]
    acc = jnp.zeros((tho, wo, c), jnp.float32)
    for dy in range(k):
        for dx in range(k):
            if stride == 1:
                tap = x_ref[dy:dy + tho, dx:dx + wo, :]
            else:
                tap = x_ref[pl.ds(dy, tho, stride=stride),
                            pl.ds(dx, wo, stride=stride), :]
            wv = w_ref[dy * k + dx, :].astype(jnp.float32).reshape(1, 1, c)
            acc = acc + tap.astype(jnp.float32) * wv
    y = acc * s_ref[...].reshape(1, 1, c) + b_ref[...].reshape(1, 1, c)
    y = y * jax.nn.sigmoid(y)
    o_ref[...] = y.astype(o_ref.dtype)

    # fused SE pool (f32, accumulated across the innermost "arbitrary" row axis)
    part = (jnp.sum(y, axis=(0, 1)) * inv_hw).reshape(1, c)

    @pl.when(pl.program_id(2) == 0)
    def _():
        pool_ref[...] = jnp.zeros_like(pool_ref)

    pool_ref[...] += part


def _se_fc_kernel(p_ref, w1_ref, b1_ref, w2_ref, b2_ref, g_ref):
    """SE excitation: pooled -> 1x1 -> SiLU -> 1x1 -> sigmoid == per-channel gate.
    bf16 MXU operands, f32 accumulate."""
    p = p_ref[...].astype(jnp.bfloat16)
    h = jnp.dot(p, w1_ref[...], preferred_element_type=jnp.float32) + b1_ref[...]
    h = h * jax.nn.sigmoid(h)
    s = jnp.dot(h.astype(jnp.bfloat16), w2_ref[...],
                preferred_element_type=jnp.float32) + b2_ref[...]
    g_ref[...] = jax.nn.sigmoid(s).astype(g_ref.dtype)


def _bilinear_up2_fused_kernel(x_ref, o_ref, *, h, w):
    """Bilinear x2 upsample (align_corners=False): the 4 output phases of each
    input pixel, written directly interleaved into one (2h, 2w, tc) block via
    strided stores (no wrapper-side stack/transpose HBM pass)."""
    def sl(dy, dx):
        return x_ref[dy:dy + h, dx:dx + w, :].astype(jnp.float32)
    x00, x01, x02 = sl(0, 0), sl(0, 1), sl(0, 2)
    x10, x11, x12 = sl(1, 0), sl(1, 1), sl(1, 2)
    x20, x21, x22 = sl(2, 0), sl(2, 1), sl(2, 2)
    ee = 0.0625 * x00 + 0.1875 * x01 + 0.1875 * x10 + 0.5625 * x11
    eo = 0.1875 * x01 + 0.0625 * x02 + 0.5625 * x11 + 0.1875 * x12
    oe = 0.1875 * x10 + 0.5625 * x11 + 0.0625 * x20 + 0.1875 * x21
    oo = 0.5625 * x11 + 0.1875 * x12 + 0.1875 * x21 + 0.0625 * x22
    dt = o_ref.dtype
    o_ref[pl.ds(0, h, stride=2), pl.ds(0, w, stride=2), :] = ee.astype(dt)
    o_ref[pl.ds(0, h, stride=2), pl.ds(1, w, stride=2), :] = eo.astype(dt)
    o_ref[pl.ds(1, h, stride=2), pl.ds(0, w, stride=2), :] = oe.astype(dt)
    o_ref[pl.ds(1, h, stride=2), pl.ds(1, w, stride=2), :] = oo.astype(dt)


def _bilinear_up2_phase_kernel(x_ref, ee_ref, eo_ref, oe_ref, oo_ref, *, h, w):
    """Fallback: phase-separated outputs (proven path; interleave done in XLA)."""
    def sl(dy, dx):
        return x_ref[dy:dy + h, dx:dx + w, :].astype(jnp.float32)
    x00, x01, x02 = sl(0, 0), sl(0, 1), sl(0, 2)
    x10, x11, x12 = sl(1, 0), sl(1, 1), sl(1, 2)
    x20, x21, x22 = sl(2, 0), sl(2, 1), sl(2, 2)
    ee_ref[...] = (0.0625 * x00 + 0.1875 * x01 + 0.1875 * x10 + 0.5625 * x11).astype(ee_ref.dtype)
    eo_ref[...] = (0.1875 * x01 + 0.0625 * x02 + 0.5625 * x11 + 0.1875 * x12).astype(eo_ref.dtype)
    oe_ref[...] = (0.1875 * x10 + 0.5625 * x11 + 0.0625 * x20 + 0.1875 * x21).astype(oe_ref.dtype)
    oo_ref[...] = (0.5625 * x11 + 0.1875 * x12 + 0.1875 * x21 + 0.0625 * x22).astype(oo_ref.dtype)


# ----------------------------------------------------------------------------
# Pallas wrappers
# ----------------------------------------------------------------------------
def pointwise_conv_bn_act(x_nhwc, w_io, scale, bias, act="silu",
                          gate=None, residual=None, x2_nhwc=None, w2_io=None):
    """1x1 conv (or im2col'd KxK conv) + affine + activation, with optional
    fused SE gate (input channels), fused residual add, and an optional fused
    second (skip) input -- split-K concat fusion."""
    n, h, w, cin = x_nhwc.shape
    cout = w_io.shape[1]
    m = h * w

    has_gate = gate is not None
    has_res = residual is not None
    has_x2 = x2_nhwc is not None
    assert not (has_x2 and (has_gate or has_res))

    # Lane-dense output for very small cout (the final 1-channel conv): pad N
    # with zero weight columns to a full 128-wide lane and slice afterwards.
    # (For mid-size couts the extra padded-channel HBM traffic outweighs the
    # masked-store penalty, so they are left as-is.)
    cout_p = cout
    if cout < 8 and not has_res:
        cout_p = 128
        pad = cout_p - cout
        w_io = jnp.pad(w_io, ((0, 0), (0, pad)))
        if has_x2:
            w2_io = jnp.pad(w2_io, ((0, 0), (0, pad)))
        scale = jnp.pad(scale, (0, pad))
        bias = jnp.pad(bias, (0, pad))

    x3 = x_nhwc.reshape(n, m, cin)
    tm = _pick_tile(m, _TM_TARGET, (16, 8))
    tn = _pick_tile(cout_p, _TN_TARGET, (256, 128))
    tk = cin if has_x2 else _pick_tile(cin, _TK_TARGET, (256, 128))
    kt = 1 if has_x2 else cin // tk
    grid = (n, m // tm, cout_p // tn, kt)

    in_specs = [
        pl.BlockSpec((None, tm, tk), lambda b, i, j, kk: (b, i, kk)),
        pl.BlockSpec((tk, tn), lambda b, i, j, kk: (kk, j)),
    ]
    args = [x3, w_io]
    if has_x2:
        cin2 = x2_nhwc.shape[-1]
        in_specs += [
            pl.BlockSpec((None, tm, cin2), lambda b, i, j, kk: (b, i, 0)),
            pl.BlockSpec((cin2, tn), lambda b, i, j, kk: (0, j)),
        ]
        args += [x2_nhwc.reshape(n, m, cin2), w2_io]
    in_specs += [
        pl.BlockSpec((1, tn), lambda b, i, j, kk: (0, j)),
        pl.BlockSpec((1, tn), lambda b, i, j, kk: (0, j)),
    ]
    args += [scale.reshape(1, cout_p).astype(jnp.float32),
             bias.reshape(1, cout_p).astype(jnp.float32)]
    if has_gate:
        in_specs.append(pl.BlockSpec((None, 1, tk), lambda b, i, j, kk: (b, 0, kk)))
        args.append(gate)                                   # (n, 1, cin) bf16
    if has_res:
        in_specs.append(pl.BlockSpec((None, tm, tn), lambda b, i, j, kk: (b, i, j)))
        args.append(residual.reshape(n, m, cout_p))

    out = pl.pallas_call(
        functools.partial(_pw_kernel, act=act, has_gate=has_gate,
                          has_res=has_res, has_x2=has_x2),
        grid=grid,
        in_specs=in_specs,
        out_specs=pl.BlockSpec((None, tm, tn), lambda b, i, j, kk: (b, i, j)),
        out_shape=jax.ShapeDtypeStruct((n, m, cout_p), STORE_DTYPE),
        scratch_shapes=[pltpu.VMEM((tm, tn), jnp.float32)],
        compiler_params=_cp(("parallel", "parallel", "parallel", "arbitrary")),
    )(*args)
    if cout_p != cout:
        out = out[:, :, :cout]
    return out.reshape(n, h, w, cout)


def depthwise_conv_bn_silu(x_nhwc, w_kkc, scale, bias, k, stride):
    """Row-tiled depthwise KxK conv ('same' padding, direct strided output)
    + BN + SiLU, with the SE global-average pool fused into the epilogue.
    Returns (activations (N,Ho,Wo,C) bf16, pooled (N,1,C) f32)."""
    n, h, w, c = x_nhwc.shape
    p = k // 2
    ho = (h + 2 * p - k) // stride + 1
    wo = (w + 2 * p - k) // stride + 1
    wp = w + 2 * p
    tho = _pick_tile(ho, 8, (1,))            # output rows per grid step
    n_rt = ho // tho
    th_in = tho * stride + (k - stride)      # input rows per tile incl. halo

    xp = jnp.pad(x_nhwc, ((0, 0), (p, p), (p, p), (0, 0)))
    if n_rt == 1:
        xw = xp[:, None]                     # (n, 1, h+2p, wp, c)
    else:
        xw = jnp.stack(
            [xp[:, rt * tho * stride: rt * tho * stride + th_in]
             for rt in range(n_rt)], axis=1)  # (n, n_rt, th_in, wp, c)

    tc = _pick_tile(c, 256, (128,))
    out, pooled = pl.pallas_call(
        functools.partial(_dw_conv_bn_silu_kernel, k=k, stride=stride,
                          tho=tho, wo=wo, inv_hw=1.0 / float(ho * wo)),
        grid=(n, c // tc, n_rt),
        in_specs=[
            pl.BlockSpec((None, None, th_in, wp, tc),
                         lambda b, ci, rt: (b, rt, 0, 0, ci)),
            pl.BlockSpec((k * k, tc), lambda b, ci, rt: (0, ci)),
            pl.BlockSpec((1, tc), lambda b, ci, rt: (0, ci)),
            pl.BlockSpec((1, tc), lambda b, ci, rt: (0, ci)),
        ],
        out_specs=[
            pl.BlockSpec((None, tho, wo, tc), lambda b, ci, rt: (b, rt, 0, ci)),
            pl.BlockSpec((None, 1, tc), lambda b, ci, rt: (b, 0, ci)),
        ],
        out_shape=[
            jax.ShapeDtypeStruct((n, ho, wo, c), STORE_DTYPE),
            jax.ShapeDtypeStruct((n, 1, c), jnp.float32),
        ],
        compiler_params=_cp(("parallel", "parallel", "arbitrary")),
    )(xw, w_kkc,
      scale.reshape(1, c).astype(jnp.float32),
      bias.reshape(1, c).astype(jnp.float32))
    return out, pooled


def se_gate(pooled, w1, b1, w2, b2):
    """SE excitation on the (fused) pooled vector: returns (N, 1, C) gates.
    The gate is applied inside the following projection matmul (fused)."""
    n, _, c = pooled.shape
    cr = w1.shape[1]
    gate = pl.pallas_call(
        _se_fc_kernel,
        grid=(1,),
        in_specs=[
            pl.BlockSpec((n, c), lambda i: (0, 0)),
            pl.BlockSpec((c, cr), lambda i: (0, 0)),
            pl.BlockSpec((1, cr), lambda i: (0, 0)),
            pl.BlockSpec((cr, c), lambda i: (0, 0)),
            pl.BlockSpec((1, c), lambda i: (0, 0)),
        ],
        out_specs=pl.BlockSpec((n, c), lambda i: (0, 0)),
        out_shape=jax.ShapeDtypeStruct((n, c), STORE_DTYPE),
        compiler_params=_cp(("arbitrary",)),
    )(pooled.reshape(n, c), w1, b1.reshape(1, cr), w2, b2.reshape(1, c))
    return gate.reshape(n, 1, c)


_UPSAMPLE_FUSED_OK = True   # flipped off if strided stores fail to lower


def _upsample2x_fused(x_nhwc):
    n, h, w, c = x_nhwc.shape
    xp = jnp.pad(x_nhwc, ((0, 0), (1, 1), (1, 1), (0, 0)), mode="edge")
    tc = _pick_tile(c, 512, (128,))
    return pl.pallas_call(
        functools.partial(_bilinear_up2_fused_kernel, h=h, w=w),
        grid=(n, c // tc),
        in_specs=[pl.BlockSpec((None, h + 2, w + 2, tc),
                               lambda b, ci: (b, 0, 0, ci))],
        out_specs=pl.BlockSpec((None, 2 * h, 2 * w, tc),
                               lambda b, ci: (b, 0, 0, ci)),
        out_shape=jax.ShapeDtypeStruct((n, 2 * h, 2 * w, c), STORE_DTYPE),
        compiler_params=_cp(("parallel", "parallel")),
    )(xp)


def _upsample2x_phases(x_nhwc):
    n, h, w, c = x_nhwc.shape
    xp = jnp.pad(x_nhwc, ((0, 0), (1, 1), (1, 1), (0, 0)), mode="edge")
    tc = _pick_tile(c, 512, (128,))
    ee, eo, oe, oo = pl.pallas_call(
        functools.partial(_bilinear_up2_phase_kernel, h=h, w=w),
        grid=(n, c // tc),
        in_specs=[pl.BlockSpec((None, h + 2, w + 2, tc),
                               lambda b, ci: (b, 0, 0, ci))],
        out_specs=[pl.BlockSpec((None, h, w, tc),
                                lambda b, ci: (b, 0, 0, ci))] * 4,
        out_shape=[jax.ShapeDtypeStruct((n, h, w, c), STORE_DTYPE)] * 4,
        compiler_params=_cp(("parallel", "parallel")),
    )(xp)
    z = jnp.stack([ee, eo, oe, oo], axis=0).reshape(2, 2, n, h, w, c)
    z = z.transpose(2, 3, 0, 4, 1, 5)               # (N, H, 2, W, 2, C)
    return z.reshape(n, 2 * h, 2 * w, c)


def upsample2x(x_nhwc):
    """nn.Upsample(scale_factor=2, mode='bilinear', align_corners=False)."""
    global _UPSAMPLE_FUSED_OK
    if _UPSAMPLE_FUSED_OK:
        try:
            return _upsample2x_fused(x_nhwc)
        except Exception:
            # strided-store form did not lower on this toolchain; use the
            # proven phase-separated path from here on.
            _UPSAMPLE_FUSED_OK = False
    return _upsample2x_phases(x_nhwc)


def im2col(x_nhwc, k, stride, pad):
    """Glue: extract KxK patches so a general conv becomes a Pallas matmul."""
    n, h, w, c = x_nhwc.shape
    xp = jnp.pad(x_nhwc, ((0, 0), (pad, pad), (pad, pad), (0, 0)))
    ho = (h + 2 * pad - k) // stride + 1
    wo = (w + 2 * pad - k) // stride + 1
    cols = []
    for dy in range(k):
        for dx in range(k):
            cols.append(xp[:, dy:dy + stride * ho:stride, dx:dx + stride * wo:stride, :])
    return jnp.concatenate(cols, axis=-1)           # (N, Ho, Wo, k*k*C)


# ----------------------------------------------------------------------------
# Parameter construction (deterministic synthetic init)
# ----------------------------------------------------------------------------
class KeyGen:
    def __init__(self, key):
        self.key = key

    def __call__(self):
        self.key, k = jax.random.split(self.key)
        return k


def conv_w(kg, cin, cout, k):
    fan_in = cin * k * k
    w = jax.random.normal(kg(), (k * k * cin, cout), jnp.float32) * jnp.sqrt(2.0 / fan_in)
    return w.astype(STORE_DTYPE)


def dw_w(kg, c, k):
    w = jax.random.normal(kg(), (k * k, c), jnp.float32) * jnp.sqrt(2.0 / (k * k))
    return w.astype(STORE_DTYPE)


def bn_p(c):
    # (gamma, beta, running_mean, running_var) -- PyTorch default init
    return (jnp.ones((c,), jnp.float32), jnp.zeros((c,), jnp.float32),
            jnp.zeros((c,), jnp.float32), jnp.ones((c,), jnp.float32))


def bn_fold(bn):
    gamma, beta, mean, var = bn
    scale = gamma / jnp.sqrt(var + BN_EPS)
    return scale, beta - mean * scale


def make_mbconv_params(kg, cin, cout, k, expand_ratio, se_squeeze):
    hidden = cin * expand_ratio
    p = {"cfg": (cin, cout, k, expand_ratio)}
    if hidden != cin:
        p["expand_w"] = conv_w(kg, cin, hidden, 1)
        p["expand_bn"] = bn_p(hidden)
    p["dw_w"] = dw_w(kg, hidden, k)
    p["dw_bn"] = bn_p(hidden)
    p["se_w1"] = conv_w(kg, hidden, se_squeeze, 1)
    p["se_b1"] = jnp.zeros((se_squeeze,), jnp.float32)
    p["se_w2"] = conv_w(kg, se_squeeze, hidden, 1)
    p["se_b2"] = jnp.zeros((hidden,), jnp.float32)
    p["proj_w"] = conv_w(kg, hidden, cout, 1)
    p["proj_bn"] = bn_p(cout)
    return p


def mbconv_forward(p, x, stride, skip=None):
    """MBConv block.  If `skip` is given, the block input is conceptually
    concat([skip, x], channel) and the concatenation is fused (split-K) into
    the expand conv; such blocks never have a residual (cin != cout)."""
    cin, cout, k, _ = p["cfg"]
    out = x
    if "expand_w" in p:
        s, b = bn_fold(p["expand_bn"])
        if skip is not None:
            c_skip = skip.shape[-1]
            out = pointwise_conv_bn_act(skip, p["expand_w"][:c_skip], s, b,
                                        act="silu",
                                        x2_nhwc=x, w2_io=p["expand_w"][c_skip:])
        else:
            out = pointwise_conv_bn_act(out, p["expand_w"], s, b, act="silu")
    s, b = bn_fold(p["dw_bn"])
    out, pooled = depthwise_conv_bn_silu(out, p["dw_w"], s, b, k, stride)
    # SE gate (per-batch, per-channel); pool came fused from the depthwise
    # kernel; the gate is applied inside the projection matmul.
    gate = se_gate(pooled, p["se_w1"], p["se_b1"], p["se_w2"], p["se_b2"])
    s, b = bn_fold(p["proj_bn"])
    residual = x if (skip is None and stride == 1 and cin == cout) else None
    out = pointwise_conv_bn_act(out, p["proj_w"], s, b, act="none",
                                gate=gate, residual=residual)
    return out


# torchvision EfficientNet-B2 stages: (expand_ratio, kernel, stride, in_ch, out_ch, layers)
EFFNET_B2_STAGES = [
    (1, 3, 1, 32, 16, 2),
    (6, 3, 2, 16, 24, 3),
    (6, 5, 2, 24, 48, 3),
    (6, 3, 2, 48, 88, 4),
    (6, 5, 1, 88, 120, 4),
    (6, 5, 2, 120, 208, 5),
    (6, 3, 1, 208, 352, 2),
]

# Decoder MBCBlocks: (in_ch, out_ch, expand_ratio), kernel=3, stride=1
DECODER_CFG = [
    (352, 136, 3), (136, 136, 3),
    (256, 80, 3), (80, 80, 3),
    (128, 40, 4), (40, 40, 4),
    (64, 16, 5), (16, 16, 5),
    (32, 16, 6), (16, 1, 6),
]


def make_encoder_params(kg):
    enc = {"stem_w": conv_w(kg, 3, 32, 3), "stem_bn": bn_p(32), "stages": []}
    for (er, k, s, cin, cout, nlayers) in EFFNET_B2_STAGES:
        blocks = []
        for i in range(nlayers):
            bin_ = cin if i == 0 else cout
            stride = s if i == 0 else 1
            squeeze = max(1, bin_ // 4)      # torchvision: input_channels // 4
            blocks.append((make_mbconv_params(kg, bin_, cout, k, er, squeeze), stride))
        enc["stages"].append(blocks)
    return enc


def make_decoder_params(kg):
    dec = []
    for (cin, cout, er) in DECODER_CFG:
        hidden = cin * er
        squeeze = int(hidden * 0.25)         # MBCBlock: SqueezeExcitation(hidden_dim, 0.25)
        dec.append(make_mbconv_params(kg, cin, cout, 3, er, squeeze))
    return dec


def make_params(key):
    kg = KeyGen(key)
    return {"enc": make_encoder_params(kg), "dec": make_decoder_params(kg)}


# ----------------------------------------------------------------------------
# Forward passes
# ----------------------------------------------------------------------------
def run_stage(blocks, x):
    for (p, stride) in blocks:
        x = mbconv_forward(p, x, stride)
    return x


def encoder_forward(enc, x):
    s, b = bn_fold(enc["stem_bn"])
    x = pointwise_conv_bn_act(im2col(x, 3, 2, 1), enc["stem_w"], s, b, act="silu")
    stages = enc["stages"]
    skips = []
    x = run_stage(stages[0], x); skips.append(x)       # Block1 = features[:2]   -> 16ch
    x = run_stage(stages[1], x); skips.append(x)       # Block2 = features[2]    -> 24ch
    x = run_stage(stages[2], x); skips.append(x)       # Block3 = features[3]    -> 48ch
    x = run_stage(stages[3], x)
    x = run_stage(stages[4], x); skips.append(x)       # Block4 = features[4:6]  -> 120ch
    x = run_stage(stages[5], x)
    x = run_stage(stages[6], x)                        # Block5 = features[6:8]  -> 352ch
    return x, skips[::-1]


def decoder_forward(params, x_nchw):
    x = jnp.transpose(x_nchw, (0, 2, 3, 1)).astype(STORE_DTYPE)    # NCHW -> NHWC
    x, skips = encoder_forward(params["enc"], x)
    dec = params["dec"]

    x = upsample2x(x)
    x = mbconv_forward(dec[0], x, 1)
    x = mbconv_forward(dec[1], x, 1)

    # torch.cat([skip, x], 1) -> upsample -> MBConv expand is fused:
    # bilinear upsample is per-channel, so the two concat operands are
    # upsampled separately and fed as a split-K pair to the expand matmul,
    # never materialising the concatenated tensor.
    for si in range(4):
        b0, b1 = 2 + 2 * si, 3 + 2 * si
        sk = upsample2x(skips[si])
        xu = upsample2x(x)
        x = mbconv_forward(dec[b0], xu, 1, skip=sk)
        x = mbconv_forward(dec[b1], x, 1)

    return jnp.transpose(x, (0, 3, 1, 2)).astype(jnp.float32)      # NHWC -> NCHW


# ----------------------------------------------------------------------------
if __name__ == "__main__":
    root = jax.random.PRNGKey(0)
    k_params, k_input = jax.random.split(root)

    params = make_params(k_params)

    # Small input consistent with the module: spatial must be divisible by 32.
    N, C, H, W = 1, 3, 64, 64
    x = jax.random.normal(k_input, (N, C, H, W), jnp.float32)

    y = decoder_forward(params, x)
    y = jax.block_until_ready(y)

    assert y.shape == (N, 1, H, W), y.shape
    assert bool(jnp.all(jnp.isfinite(y)))
    print("KERNEL_OK")
</pallas_src>

<mosaic_0001>
module attributes {stable_mosaic.version = 11 : i64} {
  func.func @_pw_kernel(%arg0: i32, %arg1: i32, %arg2: i32, %arg3: i32, %arg4: memref<1x256x27xbf16, #tpu.memory_space<vmem>>, %arg5: memref<27x32xbf16, #tpu.memory_space<vmem>>, %arg6: memref<1x32xf32, #tpu.memory_space<vmem>>, %arg7: memref<1x32xf32, #tpu.memory_space<vmem>>, %arg8: memref<1x256x32xbf16, #tpu.memory_space<vmem>>, %arg9: memref<256x32xf32, #tpu.memory_space<vmem>>) attributes {dimension_semantics = [#tpu.dimension_semantics<parallel>, #tpu.dimension_semantics<parallel>, #tpu.dimension_semantics<parallel>, #tpu.dimension_semantics<arbitrary>], iteration_bounds = array<i64: 1, 4, 1, 1>, scalar_prefetch = 0 : i64, scratch_operands = 1 : i64, tpu.core_type = #tpu.core_type<tc>, window_params = [{transform_indices = @transform_0, window_bounds = array<i64: 1, 256, 27>}, {transform_indices = @transform_1, window_bounds = array<i64: 27, 32>}, {transform_indices = @transform_2, window_bounds = array<i64: 1, 32>}, {transform_indices = @transform_3, window_bounds = array<i64: 1, 32>}, {transform_indices = @transform_4, window_bounds = array<i64: 1, 256, 32>}]} {
    %c0_i32 = arith.constant 0 : i32
    %0 = arith.cmpi eq, %arg3, %c0_i32 : i32
    %1 = arith.extui %0 : i1 to i32
    %c0_i32_0 = arith.constant 0 : i32
    %2 = arith.cmpi ne, %1, %c0_i32_0 : i32
    scf.if %2 {
      %cst_11 = arith.constant 0.000000e+00 : f32
      %13 = vector.broadcast %cst_11 : f32 to vector<256x32xf32>
      %c0_12 = arith.constant 0 : index
      %c0_13 = arith.constant 0 : index
      %14 = vector.load %arg9[%c0_12, %c0_13] : memref<256x32xf32, #tpu.memory_space<vmem>>, vector<256x32xf32>
      tpu.vector_store %arg9[%c0_12, %c0_13], %13 {strides = array<i32>} : memref<256x32xf32, #tpu.memory_space<vmem>>, vector<256x32xf32>,
    } else {
    }
    %c0 = arith.constant 0 : index
    %c0_1 = arith.constant 0 : index
    %c0_2 = arith.constant 0 : index
    %3 = vector.load %arg4[%c0, %c0_1, %c0_2] : memref<1x256x27xbf16, #tpu.memory_space<vmem>>, vector<1x256x27xbf16>
    %4 = vector.shape_cast %3 : vector<1x256x27xbf16> to vector<256x27xbf16>
    %c0_3 = arith.constant 0 : index
    %c0_4 = arith.constant 0 : index
    %5 = vector.load %arg9[%c0_3, %c0_4] : memref<256x32xf32, #tpu.memory_space<vmem>>, vector<256x32xf32>
    %c0_5 = arith.constant 0 : index
    %c0_6 = arith.constant 0 : index
    %6 = vector.load %arg5[%c0_5, %c0_6] : memref<27x32xbf16, #tpu.memory_space<vmem>>, vector<27x32xbf16>
    %cst = arith.constant dense<0.000000e+00> : vector<256x32xf32>
    %7 = tpu.matmul %4, %6, %cst {dimension_numbers = #tpu.dot_dimension_numbers<[1], [0], [0], [1], [0, 0, 1, 1], [], []>} : vector<256x27xbf16>, vector<27x32xbf16>, vector<256x32xf32> -> vector<256x32xf32>
    %8 = arith.addf %5, %7 : vector<256x32xf32>
    %c0_7 = arith.constant 0 : index
    %c0_8 = arith.constant 0 : index
    %9 = vector.load %arg9[%c0_7, %c0_8] : memref<256x32xf32, #tpu.memory_space<vmem>>, vector<256x32xf32>
    tpu.vector_store %arg9[%c0_7, %c0_8], %8 {strides = array<i32>} : memref<256x32xf32, #tpu.memory_space<vmem>>, vector<256x32xf32>,
    %c0_i32_9 = arith.constant 0 : i32
    %10 = arith.cmpi eq, %arg3, %c0_i32_9 : i32
    %11 = arith.extui %10 : i1 to i32
    %c0_i32_10 = arith.constant 0 : i32
    %12 = arith.cmpi ne, %11, %c0_i32_10 : i32
    scf.if %12 {
      %c0_11 = arith.constant 0 : index
      %c0_12 = arith.constant 0 : index
      %13 = vector.load %arg9[%c0_11, %c0_12] : memref<256x32xf32, #tpu.memory_space<vmem>>, vector<256x32xf32>
      %c0_13 = arith.constant 0 : index
      %c0_14 = arith.constant 0 : index
      %14 = vector.load %arg6[%c0_13, %c0_14] : memref<1x32xf32, #tpu.memory_space<vmem>>, vector<1x32xf32>
      %15 = vector.broadcast %14 : vector<1x32xf32> to vector<256x32xf32>
      %16 = arith.mulf %13, %15 : vector<256x32xf32>
      %c0_15 = arith.constant 0 : index
      %c0_16 = arith.constant 0 : index
      %17 = vector.load %arg7[%c0_15, %c0_16] : memref<1x32xf32, #tpu.memory_space<vmem>>, vector<1x32xf32>
      %18 = vector.broadcast %17 : vector<1x32xf32> to vector<256x32xf32>
      %19 = arith.addf %16, %18 : vector<256x32xf32>
      %20 = arith.negf %19 : vector<256x32xf32>
      %21 = math.exp %20 : vector<256x32xf32>
      %cst_17 = arith.constant 1.000000e+00 : f32
      %22 = vector.broadcast %cst_17 : f32 to vector<256x32xf32>
      %23 = arith.addf %22, %21 : vector<256x32xf32>
      %24 = arith.divf %22, %23 : vector<256x32xf32>
      %25 = arith.mulf %19, %24 : vector<256x32xf32>
      %26 = arith.truncf %25 : vector<256x32xf32> to vector<256x32xbf16>
      %c0_18 = arith.constant 0 : index
      %c0_19 = arith.constant 0 : index
      %c0_20 = arith.constant 0 : index
      %27 = vector.load %arg8[%c0_18, %c0_19, %c0_20] : memref<1x256x32xbf16, #tpu.memory_space<vmem>>, vector<1x256x32xbf16>
      %28 = vector.shape_cast %27 : vector<1x256x32xbf16> to vector<256x32xbf16>
      %29 = vector.shape_cast %26 : vector<256x32xbf16> to vector<1x256x32xbf16>
      tpu.vector_store %arg8[%c0_18, %c0_19, %c0_20], %29 {strides = array<i32>} : memref<1x256x32xbf16, #tpu.memory_space<vmem>>, vector<1x256x32xbf16>,
    } else {
    }
    return
  }
  func.func @transform_0(%arg0: i32, %arg1: i32, %arg2: i32, %arg3: i32) -> (i32, i32, i32) {
    %c0_i32 = arith.constant 0 : i32
    return %arg0, %arg1, %arg3 : i32, i32, i32
  }
  func.func @transform_1(%arg0: i32, %arg1: i32, %arg2: i32, %arg3: i32) -> (i32, i32) {
    %c0_i32 = arith.constant 0 : i32
    return %arg3, %arg2 : i32, i32
  }
  func.func @transform_2(%arg0: i32, %arg1: i32, %arg2: i32, %arg3: i32) -> (i32, i32) {
    %c0_i32 = arith.constant 0 : i32
    %c0_i32_0 = arith.constant 0 : i32
    return %c0_i32, %arg2 : i32, i32
  }
  func.func @transform_3(%arg0: i32, %arg1: i32, %arg2: i32, %arg3: i32) -> (i32, i32) {
    %c0_i32 = arith.constant 0 : i32
    %c0_i32_0 = arith.constant 0 : i32
    return %c0_i32, %arg2 : i32, i32
  }
  func.func @transform_4(%arg0: i32, %arg1: i32, %arg2: i32, %arg3: i32) -> (i32, i32, i32) {
    %c0_i32 = arith.constant 0 : i32
    return %arg0, %arg1, %arg2 : i32, i32, i32
  }
}

</mosaic_0001>

<bundles_post_ra>
// kernel: tpu_custom_call.1
= control target key start
LH: loop header
LB: loop body
LE: loop exit
PB: predicated region body
PF: predicated region fallthrough
CT: control target
= control target key end

     0   :  { %s2065_s15 = smov 0   ;;  %s2067_s16 = smov 0   ;;  %s2896_s0 = inlined_call_operand.vmem [shape: bf16[1,1024,27], index: 0, kind: input, shape index: {}]   ;;  %s2897_s1 = inlined_call_operand.vmem [shape: bf16[27,32], index: 1, kind: input, shape index: {}]   ;;  %s2898_s2 = inlined_call_operand.vmem [shape: f32[1,32], index: 2, kind: input, shape index: {}]   ;;  %s2899_s3 = inlined_call_operand.vmem [shape: f32[1,32], index: 3, kind: input, shape index: {}]   ;;  %s2900_s4 = inlined_call_operand.vmem [shape: bf16[1,1024,32], index: 4, kind: output, shape index: {}]  }
   0x1   :  { %s2069_s17 = smov 0  }
   0x2 LB: > { %s36_s18 = sadd.s32 1, %s2032_s16  ;;  %p1705_p0 = scmp.ge.s32.totalorder %s2036_s17, 1  ;;  %s2036_s17 = sphi %s2069_s17, %s14_s17   ;;  %s2032_s16 = sphi %s2067_s16, %s2942_s16   ;;  %s2028_s15 = sphi %s2065_s15, %s2941_s15  }
   0x3   : > { %p38_p1 = scmp.ge.s32.totalorder %s36_s18, 4  ;;  %p236_p2 = scmp.lt.s32.totalorder %s2036_s17, 5 }
   0x5   : > { %s2944_s18 = smov (%p38_p1, %s36_s18), 0  ;;  %p237_p3 = pnand %p1705_p0, %p236_p2 }
   0x6   : > { %s1706_s23 = sshll.u32 (!%p237_p3), %s2028_s15, 5 }
   0x7   : > { %240 = sbr.rel (%p237_p3) target bundleno = 354 (0x162), region = 36  ;;  %p293_p4 = scmp.lt.s32.totalorder (!%p237_p3), %s1706_s23, 127 }
   0xc   : > { %v1780_v0 = vld [vmem:[%s2897_s1 + $0x8] sm:$0xf]  ;;  %v1849_v1 = vld [vmem:[%s2897_s1 + $0x8] sm:$0x30]  ;;  %vm577_vm0 = vcmask 1044480   ;;  %vm578_vm1 = vcmask 1045504  }
   0xd   : > { %v1781_v2 = vor.u32 %v1849_v1, %v1780_v0  ;;  %v2038_v3 = vmov 65535   ;;  %s2946_s23 = smov (!%p293_p4, %s1706_s23), 127  ;;  %v1848_v7 = vld [vmem:[%s2897_s1] sm:$0xff]  ;;  %vm528_vm2 = vcmask 220160   ;;  %vm336_vm3 = vcmask 261120  }
   0xe   : > { %v579_v4 = vsel %vm577_vm0, 4294967295, %v2038_v3  ;;  %s1707_s26 = sshll.u32 %s2946_s23, 2  ;;  %v2039_v16 = vmov 0.0   ;;  %v2171_v35 = vld [vmem:[%s2898_s2] ss:$0 sm:$0xff]  ;;  %vm1517_vm9 = vcmask 257024  }
   0xf   : > { %v580_v5 = vsel %vm578_vm1, %v579_v4, 0  ;;  %s2100_s29 = scalar_lea.vmem %s2896_s0, %s1707_s26  ;;  %337 = vst.msk [vmem:[#allocation2] sm:$0xff] %vm336_vm3, %v2039_v16  ;;  %v2176_v42 = vld [vmem:[%s2899_s3] ss:$0 sm:$0xff]  ;;  %s2305_s10 = scalar_lea.vmem %s2900_s4, %s1707_s26 }
  0x10   : > { %v582_v6 = vand.u32 %v1781_v2, %v580_v5  ;;  %v1832_v8 = vld [vmem:[%s2100_s29] sm:$0xff]  ;;  %v1833_v12 = vld [vmem:[%s2100_s29 + $0x8] sm:$0xff]  ;;  %338 = vst.msk [vmem:[#allocation2 + $0x8] sm:$0xff] %vm336_vm3, %v2039_v16  ;;  %v1834_v17 = vld [vmem:[%s2100_s29 + $0x10] sm:$0xff] }
  0x11   : > { %v1836_v9 = vld [vmem:[%s2100_s29 + $0x20] sm:$0xff]  ;;  %v1837_v13 = vld [vmem:[%s2100_s29 + $0x28] sm:$0xff]  ;;  %339 = vst.msk [vmem:[#allocation2 + $0x10] sm:$0xff] %vm336_vm3, %v2039_v16  ;;  %v1838_v18 = vld [vmem:[%s2100_s29 + $0x30] sm:$0xff] }
  0x12   : > { %590 = vmatpush.bf16.msra.mxu0 %v582_v6  ;;  %1850 = vmatpush.bf16.msra.mxu1 %v582_v6  ;;  %v1840_v10 = vld [vmem:[%s2100_s29 + $0x40] sm:$0xff]  ;;  %v1841_v14 = vld [vmem:[%s2100_s29 + $0x48] sm:$0xff]  ;;  %340 = vst.msk [vmem:[#allocation2 + $0x18] sm:$0xff] %vm336_vm3, %v2039_v16  ;;  %v1842_v19 = vld [vmem:[%s2100_s29 + $0x50] sm:$0xff] }
  0x13   : > { %1851 = vmatpush.bf16.msra.mxu2 %v582_v6  ;;  %1852 = vmatpush.bf16.msra.mxu3 %v582_v6  ;;  %v1844_v11 = vld [vmem:[%s2100_s29 + $0x60] sm:$0xff]  ;;  %v1845_v15 = vld [vmem:[%s2100_s29 + $0x68] sm:$0xff]  ;;  %341 = vst.msk [vmem:[#allocation2 + $0x20] sm:$0xff] %vm336_vm3, %v2039_v16  ;;  %v1846_v20 = vld [vmem:[%s2100_s29 + $0x70] sm:$0xff] }
  0x14   : > { %342 = vst.msk [vmem:[#allocation2 + $0x28] sm:$0xff] %vm336_vm3, %v2039_v16  ;;  %v1835_v21 = vld [vmem:[%s2100_s29 + $0x18] sm:$0xff] }
  0x15   : > { %343 = vst.msk [vmem:[#allocation2 + $0x30] sm:$0xff] %vm336_vm3, %v2039_v16  ;;  %v1839_v22 = vld [vmem:[%s2100_s29 + $0x38] sm:$0xff] }
  0x16   : > { %591 = vmatpush.bf16.msra.mxu0 %v1848_v7  ;;  %1853 = vmatpush.bf16.msra.mxu1 %v1848_v7  ;;  %344 = vst.msk [vmem:[#allocation2 + $0x38] sm:$0xff] %vm336_vm3, %v2039_v16  ;;  %v1843_v23 = vld [vmem:[%s2100_s29 + $0x58] sm:$0xff]  ;;  %v401_v25 = vld [vmem:[#allocation2] sm:$0xff] }
  0x17   : > { %1854 = vmatpush.bf16.msra.mxu2 %v1848_v7  ;;  %1855 = vmatpush.bf16.msra.mxu3 %v1848_v7  ;;  %345 = vst.msk [vmem:[#allocation2 + $0x40] sm:$0xff] %vm336_vm3, %v2039_v16  ;;  %v1847_v24 = vld [vmem:[%s2100_s29 + $0x78] sm:$0xff]  ;;  %v402_v33 = vld [vmem:[#allocation2 + $0x8] sm:$0xff] }
  0x18   : > { %346 = vst.msk [vmem:[#allocation2 + $0x48] sm:$0xff] %vm336_vm3, %v2039_v16  ;;  %v403_v53 = vld [vmem:[#allocation2 + $0x10] sm:$0xff] }
  0x19   : > { %1782 = vmatmul.msk.bf16.vlgmr.msra.gmra.mxu0 %vm528_vm2, %v1832_v8  ;;  %1786 = vmatmul.msk.bf16.vlgmr.msra.gmra.mxu1 %vm528_vm2, %v1836_v9  ;;  %347 = vst.msk [vmem:[#allocation2 + $0x50] sm:$0xff] %vm336_vm3, %v2039_v16 }
  0x1a   : > { %1790 = vmatmul.msk.bf16.vlgmr.msra.gmra.mxu2 %vm528_vm2, %v1840_v10  ;;  %1794 = vmatmul.msk.bf16.vlgmr.msra.gmra.mxu3 %vm528_vm2, %v1844_v11  ;;  %348 = vst.msk [vmem:[#allocation2 + $0x58] sm:$0xff] %vm336_vm3, %v2039_v16 }
  0x1b   : > { %349 = vst.msk [vmem:[#allocation2 + $0x60] sm:$0xff] %vm336_vm3, %v2039_v16 }
  0x1c   : > { %350 = vst.msk [vmem:[#allocation2 + $0x68] sm:$0xff] %vm336_vm3, %v2039_v16 }
  0x1d   : > { %351 = vst.msk [vmem:[#allocation2 + $0x70] sm:$0xff] %vm336_vm3, %v2039_v16 }
  0x1e   : > { %352 = vst.msk [vmem:[#allocation2 + $0x78] sm:$0xff] %vm336_vm3, %v2039_v16  ;;  %v409_v26 = vld [vmem:[#allocation2 + $0x40] sm:$0xff] }
  0x1f   : > { %353 = vst.msk [vmem:[#allocation2 + $0x80] sm:$0xff] %vm336_vm3, %v2039_v16  ;;  %v410_v34 = vld [vmem:[#allocation2 + $0x48] sm:$0xff] }
  0x20   : > { %354 = vst.msk [vmem:[#allocation2 + $0x88] sm:$0xff] %vm336_vm3, %v2039_v16  ;;  %v411_v54 = vld [vmem:[#allocation2 + $0x50] sm:$0xff] }
  0x21   : > { %355 = vst.msk [vmem:[#allocation2 + $0x90] sm:$0xff] %vm336_vm3, %v2039_v16 }
  0x22   : > { %356 = vst.msk [vmem:[#allocation2 + $0x98] sm:$0xff] %vm336_vm3, %v2039_v16 }
  0x23   : > { %357 = vst.msk [vmem:[#allocation2 + $0xa0] sm:$0xff] %vm336_vm3, %v2039_v16 }
  0x24   : > { %358 = vst.msk [vmem:[#allocation2 + $0xa8] sm:$0xff] %vm336_vm3, %v2039_v16 }
  0x25   : > { %359 = vst.msk [vmem:[#allocation2 + $0xb0] sm:$0xff] %vm336_vm3, %v2039_v16 }
  0x26   : > { %360 = vst.msk [vmem:[#allocation2 + $0xb8] sm:$0xff] %vm336_vm3, %v2039_v16  ;;  %v417_v31 = vld [vmem:[#allocation2 + $0x80] sm:$0xff] }
  0x27   : > { %361 = vst.msk [vmem:[#allocation2 + $0xc0] sm:$0xff] %vm336_vm3, %v2039_v16  ;;  %v418_v50 = vld [vmem:[#allocation2 + $0x88] sm:$0xff] }
  0x28   : > { %362 = vst.msk [vmem:[#allocation2 + $0xc8] sm:$0xff] %vm336_vm3, %v2039_v16  ;;  %v419_v11 = vld [vmem:[#allocation2 + $0x90] sm:$0xff] }
  0x29   : > { %1783 = vmatmul.msk.bf16.gmra.mxu0 %vm528_vm2, %v1833_v12  ;;  %1787 = vmatmul.msk.bf16.gmra.mxu1 %vm528_vm2, %v1837_v13  ;;  %363 = vst.msk [vmem:[#allocation2 + $0xd0] sm:$0xff] %vm336_vm3, %v2039_v16 }
  0x2a   : > { %1791 = vmatmul.msk.bf16.gmra.mxu2 %vm528_vm2, %v1841_v14  ;;  %1795 = vmatmul.msk.bf16.gmra.mxu3 %vm528_vm2, %v1845_v15  ;;  %364 = vst.msk [vmem:[#allocation2 + $0xd8] sm:$0xff] %vm336_vm3, %v2039_v16 }
  0x2b   : > { %365 = vst.msk [vmem:[#allocation2 + $0xe0] sm:$0xff] %vm336_vm3, %v2039_v16 }
  0x2c   : > { %366 = vst.msk [vmem:[#allocation2 + $0xe8] sm:$0xff] %vm336_vm3, %v2039_v16 }
  0x2d   : > { %367 = vst.msk [vmem:[#allocation2 + $0xf0] sm:$0xff] %vm336_vm3, %v2039_v16 }
  0x2e   : > { %368 = vst.msk [vmem:[#allocation2 + $0xf8] sm:$0xff] %vm336_vm3, %v2039_v16  ;;  %v425_v32 = vld [vmem:[#allocation2 + $0xc0] sm:$0xff] }
  0x2f   : > { %v426_v51 = vld [vmem:[#allocation2 + $0xc8] sm:$0xff] }
  0x30   : > { %v427_v14 = vld [vmem:[#allocation2 + $0xd0] sm:$0xff] }
  0x39   : > { %1784 = vmatmul.msk.bf16.gmra.mxu0 %vm528_vm2, %v1834_v17  ;;  %1788 = vmatmul.msk.bf16.gmra.mxu1 %vm528_vm2, %v1838_v18 }
  0x3a   : > { %1792 = vmatmul.msk.bf16.gmra.mxu2 %vm528_vm2, %v1842_v19  ;;  %1796 = vmatmul.msk.bf16.gmra.mxu3 %vm528_vm2, %v1846_v20 }
  0x49   : > { %1785 = vmatmul.msk.bf16.gmra.mxu0 %vm528_vm2, %v1835_v21  ;;  %1789 = vmatmul.msk.bf16.gmra.mxu1 %vm528_vm2, %v1839_v22 }
  0x4a   : > { %1793 = vmatmul.msk.bf16.gmra.mxu2 %vm528_vm2, %v1843_v23  ;;  %1797 = vmatmul.msk.bf16.gmra.mxu3 %vm528_vm2, %v1847_v24 }
  0x96   : > { %v593_v27 = vpop.f32.mrf.mxu0  ;;  %v613_v28 = vpop.f32.mrf.mxu1 }
  0x97   : > { %v673_v29 = vadd.f32 %v593_v27, %v401_v25  ;;  %v681_v30 = vadd.f32 %v613_v28, %v409_v26  ;;  %v404_v28 = vld [vmem:[#allocation2 + $0x18] sm:$0xff] }
  0x99   : > { %706 = vst.msk [vmem:[#allocation2] sm:$0xff] %vm336_vm3, %v673_v29 }
  0x9a   : > { %714 = vst.msk [vmem:[#allocation2 + $0x40] sm:$0xff] %vm336_vm3, %v681_v30 }
  0x9d   : > { %v633_v36 = vpop.f32.mrf.mxu2  ;;  %v653_v37 = vpop.f32.mrf.mxu3 }
  0x9e   : > { %v689_v38 = vadd.f32 %v633_v36, %v417_v31  ;;  %v697_v39 = vadd.f32 %v653_v37, %v425_v32  ;;  %v595_v40 = vpop.f32.mrf.mxu0  ;;  %v615_v41 = vpop.f32.mrf.mxu1 }
  0x9f   : > { %v674_v43 = vadd.f32 %v595_v40, %v402_v33  ;;  %v682_v44 = vadd.f32 %v615_v41, %v410_v34  ;;  %v412_v33 = vld [vmem:[#allocation2 + $0x58] sm:$0xff] }
  0xa0   : > { %v741_v45 = vld [vmem:[#allocation2] sm:$0xff]  ;;  %722 = vst.msk [vmem:[#allocation2 + $0x80] sm:$0xff] %vm336_vm3, %v689_v38 }
  0xa1   : > { %v777_v46 = vmul.f32 %v2171_v35, %v741_v45  ;;  %v749_v47 = vld [vmem:[#allocation2 + $0x40] sm:$0xff]  ;;  %730 = vst.msk [vmem:[#allocation2 + $0xc0] sm:$0xff] %vm336_vm3, %v697_v39 }
  0xa2   : > { %v785_v48 = vmul.f32 %v2171_v35, %v749_v47  ;;  %707 = vst.msk [vmem:[#allocation2 + $0x8] sm:$0xff] %vm336_vm3, %v674_v43 }
  0xa3   : > { %v2184_v49 = vadd.f32 %v2176_v42, %v777_v46  ;;  %715 = vst.msk [vmem:[#allocation2 + $0x48] sm:$0xff] %vm336_vm3, %v682_v44 }
  0xa4   : > { %v2188_v52 = vadd.f32 %v2176_v42, %v785_v48 }
  0xa5   : > { %v1798_v55 = vmul.f32 -1.442695, %v2184_v49  ;;  %v635_v56 = vpop.f32.mrf.mxu2  ;;  %v655_v57 = vpop.f32.mrf.mxu3 }
  0xa6   : > { %v1806_v58 = vmul.f32 -1.442695, %v2188_v52  ;;  %v690_v59 = vadd.f32 %v635_v56, %v418_v50  ;;  %v698_v60 = vadd.f32 %v655_v57, %v426_v51  ;;  %v598_v61 = vpop.f32.mrf.mxu0  ;;  %v618_v62 = vpop.f32.mrf.mxu1 }
  0xa7   : > { %1884 = vpow2.f32 %v1798_v55  ;;  %v757_v63 = vld [vmem:[#allocation2 + $0x80] sm:$0xff]  ;;  %v675_v0 = vadd.f32 %v598_v61, %v403_v53  ;;  %v683_v1 = vadd.f32 %v618_v62, %v411_v54 }
  0xa8   : > { %1886 = vpow2.f32 %v1806_v58  ;;  %v793_v2 = vmul.f32 %v2171_v35, %v757_v63  ;;  %v765_v3 = vld [vmem:[#allocation2 + $0xc0] sm:$0xff]  ;;  %723 = vst.msk [vmem:[#allocation2 + $0x88] sm:$0xff] %vm336_vm3, %v690_v59 }
  0xa9   : > { %v801_v4 = vmul.f32 %v2171_v35, %v765_v3  ;;  %v742_v5 = vld [vmem:[#allocation2 + $0x8] sm:$0xff]  ;;  %731 = vst.msk [vmem:[#allocation2 + $0xc8] sm:$0xff] %vm336_vm3, %v698_v60 }
  0xaa   : > { %v2197_v6 = vadd.f32 %v2176_v42, %v793_v2  ;;  %v778_v7 = vmul.f32 %v2171_v35, %v742_v5  ;;  %v750_v8 = vld [vmem:[#allocation2 + $0x48] sm:$0xff]  ;;  %708 = vst.msk [vmem:[#allocation2 + $0x10] sm:$0xff] %vm336_vm3, %v675_v0 }
  0xab   : > { %v2202_v9 = vadd.f32 %v2176_v42, %v801_v4  ;;  %v786_v10 = vmul.f32 %v2171_v35, %v750_v8  ;;  %716 = vst.msk [vmem:[#allocation2 + $0x50] sm:$0xff] %vm336_vm3, %v683_v1 }
  0xac   : > { %v1814_v12 = vmul.f32 -1.442695, %v2197_v6  ;;  %v2208_v13 = vadd.f32 %v2176_v42, %v778_v7 }
  0xad   : > { %v1885_v15 = vpop.eup %1884  ;;  %v1822_v16 = vmul.f32 -1.442695, %v2202_v9  ;;  %v2212_v17 = vadd.f32 %v2176_v42, %v786_v10  ;;  %v638_v18 = vpop.f32.mrf.mxu2 }
  0xae   : > { %v658_v19 = vpop.f32.mrf.mxu3  ;;  %v1887_v20 = vpop.eup %1886  ;;  %v2214_v21 = vadd.f32 1.0, %v1885_v15  ;;  %1888 = vpow2.f32 %v1814_v12  ;;  %v1799_v22 = vmul.f32 -1.442695, %v2208_v13  ;;  %v691_v23 = vadd.f32 %v638_v18, %v419_v11 }
  0xaf   : > { %v2217_v24 = vadd.f32 1.0, %v1887_v20  ;;  %1890 = vpow2.f32 %v1822_v16  ;;  %v1807_v25 = vmul.f32 -1.442695, %v2212_v17  ;;  %v758_v26 = vld [vmem:[#allocation2 + $0x88] sm:$0xff]  ;;  %v699_v27 = vadd.f32 %v658_v19, %v427_v14  ;;  %v600_v29 = vpop.f32.mrf.mxu0  ;;  %v620_v34 = vpop.f32.mrf.mxu1 }
  0xb0   : > { %1892 = vrcp.f32 %v2214_v21  ;;  %724 = vst.msk [vmem:[#allocation2 + $0x90] sm:$0xff] %vm336_vm3, %v691_v23  ;;  %v794_v30 = vmul.f32 %v2171_v35, %v758_v26  ;;  %v766_v31 = vld [vmem:[#allocation2 + $0xc8] sm:$0xff]  ;;  %v982_v36 = vand.u32 2147483647, %v2214_v21  ;;  %v984_v37 = vand.u32 2147483648, %v2214_v21 }
  0xb1   : > { %1894 = vrcp.f32 %v2217_v24  ;;  %732 = vst.msk [vmem:[#allocation2 + $0xd0] sm:$0xff] %vm336_vm3, %v699_v27  ;;  %v743_v32 = vld [vmem:[#allocation2 + $0x10] sm:$0xff]  ;;  %v1102_v40 = vand.u32 2147483647, %v2217_v24  ;;  %v1104_v41 = vand.u32 2147483648, %v2217_v24  ;;  %v676_v44 = vadd.f32 %v600_v29, %v404_v28 }
  0xb2   : > { %1896 = vpow2.f32 %v1799_v22  ;;  %v751_v38 = vld [vmem:[#allocation2 + $0x50] sm:$0xff]  ;;  %v2230_v43 = vadd.f32 %v2176_v42, %v794_v30  ;;  %v802_v47 = vmul.f32 %v2171_v35, %v766_v31  ;;  %v779_v48 = vmul.f32 %v2171_v35, %v743_v32 }
  0xb3   : > { %1898 = vpow2.f32 %v1807_v25  ;;  %v684_v50 = vadd.f32 %v620_v34, %v412_v33  ;;  %vm978_vm4 = vweird.f32 %v2214_v21  ;;  %vm1098_vm5 = vweird.f32 %v2217_v24  ;;  %709 = vst.msk [vmem:[#allocation2 + $0x18] sm:$0xff] %vm336_vm3, %v676_v44 }
  0xb4   : > { %v1889_v39 = vpop.eup %1888  ;;  %v787_v54 = vmul.f32 %v2171_v35, %v751_v38  ;;  %vm2243_vm6 = vcmp.eq.f32.partialorder %v982_v36, 8.507059e+37  ;;  %v985_v58 = vor.u32 1.1754944e-38, %v984_v37  ;;  %vm2250_vm7 = vcmp.eq.f32.partialorder %v1102_v40, 8.507059e+37 }
  0xb5   : > { %v1891_v45 = vpop.eup %1890  ;;  %v2232_v46 = vadd.f32 1.0, %v1889_v39  ;;  %717 = vst.msk [vmem:[#allocation2 + $0x58] sm:$0xff] %vm336_vm3, %v684_v50  ;;  %v1105_v62 = vor.u32 1.1754944e-38, %v1104_v41  ;;  %v1815_v63 = vmul.f32 -1.442695, %v2230_v43  ;;  %v2257_v2 = vadd.f32 %v2176_v42, %v802_v47 }
  0xb6   : > { %v1893_v51 = vpop.eup %1892  ;;  %v2238_v53 = vadd.f32 1.0, %v1891_v45  ;;  %v2260_v3 = vadd.f32 %v2176_v42, %v779_v48  ;;  %v2264_v7 = vadd.f32 %v2176_v42, %v787_v54 }
  0xb7   : > { %v1895_v55 = vpop.eup %1894  ;;  %v974_v56 = vmul.f32 %v1893_v51, %v2214_v21  ;;  %1900 = vrcp.f32 %v2232_v46  ;;  %vm979_vm8 = vweird.f32 %v1893_v51  ;;  %v1222_v5 = vand.u32 2147483647, %v2232_v46  ;;  %v759_v23 = vld [vmem:[#allocation2 + $0x90] sm:$0xff] }
  0xb8   : > { %v1897_v59 = vpop.eup %1896  ;;  %v1094_v60 = vmul.f32 %v1895_v55, %v2217_v24  ;;  %1902 = vrcp.f32 %v2238_v53  ;;  %v1224_v10 = vand.u32 2147483648, %v2232_v46  ;;  %vm1099_vm10 = vweird.f32 %v1895_v55  ;;  %vm980_vm12 = vmor %vm978_vm4, %vm979_vm8 }
  0xb9   : > { %v1899_v0 = vpop.eup %1898  ;;  %v975_v1 = vsub.f32 1.0, %v974_v56  ;;  %v2267_v11 = vadd.f32 1.0, %v1897_v59  ;;  %v1342_v15 = vand.u32 2147483647, %v2238_v53  ;;  %1904 = vpow2.f32 %v1815_v63  ;;  %vm1100_vm15 = vmor %vm1098_vm5, %vm1099_vm10 }
  0xba   : > { %v1095_v4 = vsub.f32 1.0, %v1094_v60  ;;  %v2269_v12 = vadd.f32 1.0, %v1899_v0  ;;  %vm1218_vm11 = vweird.f32 %v2232_v46  ;;  %v1344_v19 = vand.u32 2147483648, %v2238_v53 }
  0xbb   : > { %v976_v8 = vmul.f32 %v1893_v51, %v975_v1  ;;  %1906 = vrcp.f32 %v2267_v11  ;;  %vm2279_vm13 = vcmp.eq.f32.partialorder %v1222_v5, 8.507059e+37  ;;  %vm1338_vm14 = vweird.f32 %v2238_v53 }
  0xbc   : > { %v1096_v14 = vmul.f32 %v1895_v55, %v1095_v4  ;;  %v1225_v27 = vor.u32 1.1754944e-38, %v1224_v10  ;;  %1908 = vrcp.f32 %v2269_v12  ;;  %v1823_v21 = vmul.f32 -1.442695, %v2257_v2 }
  0xbd   : > { %v1901_v16 = vpop.eup %1900  ;;  %v977_v18 = vadd.f32 %v1893_v51, %v976_v8  ;;  %vm2292_vm0 = vcmp.eq.f32.partialorder %v1342_v15, 8.507059e+37  ;;  %v1345_v34 = vor.u32 1.1754944e-38, %v1344_v19  ;;  %v997_v36 = vand.u32 2147483647, %v2267_v11 }
  0xbe   : > { %v1097_v20 = vadd.f32 %v1895_v55, %v1096_v14  ;;  %v1214_v22 = vmul.f32 %v1901_v16, %v2232_v46  ;;  %v1903_v25 = vpop.eup %1902  ;;  %vm1219_vm1 = vweird.f32 %v1901_v16  ;;  %1910 = vpow2.f32 %v1823_v21 }
  0xbf   : > { %v981_v26 = vsel %vm980_vm12, %v1893_v51, %v977_v18  ;;  %v1334_v31 = vmul.f32 %v1903_v25, %v2238_v53  ;;  %v1905_v37 = vpop.eup %1904  ;;  %vm1339_vm2 = vweird.f32 %v1903_v25  ;;  %vm1220_vm4 = vmor %vm1218_vm11, %vm1219_vm1  ;;  %vm993_vm5 = vweird.f32 %v2267_v11 }
  0xc0   : > { %v986_v28 = vsel %vm2243_vm6, %v985_v58, %v981_v26  ;;  %v1101_v29 = vsel %vm1100_vm15, %v1895_v55, %v1097_v20  ;;  %v1215_v30 = vsub.f32 1.0, %v1214_v22  ;;  %v2308_v44 = vadd.f32 1.0, %v1905_v37 }
  0xc1   : > { %v1453_v33 = vmul.f32 %v986_v28, %v2184_v49  ;;  %v1106_v24 = vsel %vm2250_vm7, %v1105_v62, %v1101_v29  ;;  %v1335_v40 = vsub.f32 1.0, %v1334_v31  ;;  %v1907_v49 = vpop.eup %1906  ;;  %vm2316_vm6 = vcmp.eq.f32.partialorder %v997_v36, 8.507059e+37  ;;  %vm1340_vm7 = vmor %vm1338_vm14, %vm1339_vm2  ;;  %v767_v29 = vld [vmem:[#allocation2 + $0xd0] sm:$0xff] }
  0xc2   : > { %v1461_v38 = vmul.f32 %v1106_v24, %v2188_v52  ;;  %v1216_v39 = vmul.f32 %v1901_v16, %v1215_v30  ;;  %v989_v50 = vmul.f32 %v1907_v49, %v2267_v11  ;;  %v1909_v51 = vpop.eup %1908  ;;  %v999_v54 = vand.u32 2147483648, %v2267_v11  ;;  %v744_v30 = vld [vmem:[#allocation2 + $0x18] sm:$0xff] }
  0xc3   : > { %v1485_v41 = vpack.c.bf16 %v1453_v33, %v1453_v33  ;;  %v1336_v48 = vmul.f32 %v1903_v25, %v1335_v40  ;;  %1912 = vrcp.f32 %v2308_v44  ;;  %v1109_v58 = vmul.f32 %v1909_v51, %v2269_v12  ;;  %v640_v33 = vpop.f32.mrf.mxu2 }
  0xc4   : > { %v1493_v45 = vpack.c.bf16 %v1461_v38, %v1461_v38  ;;  %v1217_v47 = vadd.f32 %v1901_v16, %v1216_v39  ;;  %v990_v57 = vsub.f32 1.0, %v989_v50  ;;  %vm994_vm8 = vweird.f32 %v1907_v49  ;;  %v1911_v0 = vpop.eup %1910  ;;  %v752_v50 = vld [vmem:[#allocation2 + $0x58] sm:$0xff] }
  0xc5   : > { %1518 = vst.msk [vmem:[%s2305_s10] sm:$0xf] %vm1517_vm9, %v1485_v41  ;;  %v1337_v56 = vadd.f32 %v1903_v25, %v1336_v48  ;;  %vm1113_vm10 = vweird.f32 %v2269_v12  ;;  %v1117_v59 = vand.u32 2147483647, %v2269_v12  ;;  %v1110_v63 = vsub.f32 1.0, %v1109_v58  ;;  %vm995_vm12 = vmor %vm993_vm5, %vm994_vm8  ;;  %v603_v41 = vpop.f32.mrf.mxu0 }
  0xc6   : > { %1526 = vst.msk [vmem:[%s2305_s10 + $0x20] sm:$0xf] %vm1517_vm9, %v1493_v45  ;;  %v1221_v55 = vsel %vm1220_vm4, %v1901_v16, %v1217_v47  ;;  %v991_v62 = vmul.f32 %v1907_v49, %v990_v57  ;;  %vm1114_vm11 = vweird.f32 %v1909_v51  ;;  %v1119_v4 = vand.u32 2147483648, %v2269_v12 }
  0xc7   : > { %v1226_v46 = vsel %vm2279_vm13, %v1225_v27, %v1221_v55  ;;  %v1341_v61 = vsel %vm1340_vm7, %v1903_v25, %v1337_v56  ;;  %v1800_v53 = vmul.f32 -1.442695, %v2260_v3  ;;  %v1111_v14 = vmul.f32 %v1909_v51, %v1110_v63  ;;  %vm1115_vm13 = vmor %vm1113_vm10, %vm1114_vm11 }
  0xc8   : > { %v1469_v60 = vmul.f32 %v1226_v46, %v2197_v6  ;;  %v1346_v1 = vsel %vm2292_vm0, %v1345_v34, %v1341_v61  ;;  %v992_v10 = vadd.f32 %v1907_v49, %v991_v62  ;;  %v1000_v6 = vor.u32 1.1754944e-38, %v999_v54  ;;  %v623_v62 = vpop.f32.mrf.mxu1 }
  0xc9   : > { %v1477_v8 = vmul.f32 %v1346_v1, %v2202_v9  ;;  %v1913_v15 = vpop.eup %1912  ;;  %v2341_v16 = vadd.f32 1.0, %v1911_v0  ;;  %1914 = vpow2.f32 %v1800_v53  ;;  %v1808_v18 = vmul.f32 -1.442695, %v2264_v7  ;;  %v405_v53 = vld [vmem:[#allocation2 + $0x20] sm:$0xff] }
  0xca   : > { %v1501_v5 = vpack.c.bf16 %v1469_v60, %v1469_v60  ;;  %v996_v20 = vsel %vm995_vm12, %v1907_v49, %v992_v10  ;;  %v1112_v22 = vadd.f32 %v1909_v51, %v1111_v14  ;;  %v1229_v9 = vmul.f32 %v1913_v15, %v2308_v44  ;;  %v660_v49 = vpop.f32.mrf.mxu3 }
  0xcb   : > { %v1509_v19 = vpack.c.bf16 %v1477_v8, %v1477_v8  ;;  %v1001_v25 = vsel %vm2316_vm6, %v1000_v6, %v996_v20  ;;  %vm1118_vm14 = vcmp.eq.f32.partialorder %v1117_v59, 8.507059e+37  ;;  %v1120_v11 = vor.u32 1.1754944e-38, %v1119_v4  ;;  %v428_v4 = vld [vmem:[#allocation2 + $0xd8] sm:$0xff]  ;;  %v421_v20 = vld [vmem:[#allocation2 + $0xa0] sm:$0xff] }
  0xcc   : > { %1534 = vst.msk [vmem:[%s2305_s10 + $0x40] sm:$0xf] %vm1517_vm9, %v1501_v5  ;;  %1916 = vrcp.f32 %v2341_v16  ;;  %v1454_v26 = vmul.f32 %v1001_v25, %v2208_v13  ;;  %v1116_v27 = vsel %vm1115_vm13, %v1909_v51, %v1112_v22  ;;  %v1230_v21 = vsub.f32 1.0, %v1229_v9  ;;  %v420_v13 = vld [vmem:[#allocation2 + $0x98] sm:$0xff]  ;;  %v643_v22 = vpop.f32.mrf.mxu2 }
  0xcd   : > { %1542 = vst.msk [vmem:[%s2305_s10 + $0x60] sm:$0xf] %vm1517_vm9, %v1509_v19  ;;  %v1239_v28 = vand.u32 2147483648, %v2308_v44  ;;  %v1121_v31 = vsel %vm1118_vm14, %v1120_v11, %v1116_v27  ;;  %v1237_v32 = vand.u32 2147483647, %v2308_v44  ;;  %1918 = vpow2.f32 %v1808_v18  ;;  %v413_v19 = vld [vmem:[#allocation2 + $0x60] sm:$0xff] }
  0xce   : > { %v795_v12 = vmul.f32 %v2171_v35, %v759_v23  ;;  %v1486_v24 = vpack.c.bf16 %v1454_v26, %v1454_v26  ;;  %v1462_v34 = vmul.f32 %v1121_v31, %v2212_v17  ;;  %v1231_v36 = vmul.f32 %v1913_v15, %v1230_v21  ;;  %v406_v31 = vld [vmem:[#allocation2 + $0x28] sm:$0xff] }
  0xcf   : > { %vm1234_vm15 = vweird.f32 %v1913_v15  ;;  %v1915_v37 = vpop.eup %1914  ;;  %vm1233_vm0 = vweird.f32 %v2308_v44  ;;  %v803_v39 = vmul.f32 %v2171_v35, %v767_v29  ;;  %v780_v40 = vmul.f32 %v2171_v35, %v744_v30  ;;  %v429_v29 = vld [vmem:[#allocation2 + $0xe0] sm:$0xff] }
  0xd0   : > { %v2362_v38 = vadd.f32 %v2176_v42, %v795_v12  ;;  %1519 = vst.msk [vmem:[%s2305_s10 + $0x4] sm:$0xf] %vm1517_vm9, %v1486_v24  ;;  %v1494_v45 = vpack.c.bf16 %v1462_v34, %v1462_v34  ;;  %v1232_v17 = vadd.f32 %v1913_v15, %v1231_v36  ;;  %v1240_v47 = vor.u32 1.1754944e-38, %v1239_v28  ;;  %vm1235_vm1 = vmor %vm1233_vm0, %vm1234_vm15 }
  0xd1   : > { %v2368_v48 = vadd.f32 1.0, %v1915_v37  ;;  %v2373_v52 = vadd.f32 %v2176_v42, %v803_v39  ;;  %v2376_v54 = vadd.f32 %v2176_v42, %v780_v40  ;;  %v692_v55 = vadd.f32 %v640_v33, %v420_v13 }
  0xd2   : > { %v1917_v51 = vpop.eup %1916  ;;  %v1816_v44 = vmul.f32 -1.442695, %v2362_v38  ;;  %1527 = vst.msk [vmem:[%s2305_s10 + $0x24] sm:$0xf] %vm1517_vm9, %v1494_v45  ;;  %v1236_v56 = vsel %vm1235_vm1, %v1913_v15, %v1232_v17  ;;  %vm1238_vm2 = vcmp.eq.f32.partialorder %v1237_v32, 8.507059e+37  ;;  %v1359_v60 = vand.u32 2147483648, %v2341_v16  ;;  %v663_v30 = vpop.f32.mrf.mxu3 }
  0xd3   : > { %v1349_v57 = vmul.f32 %v1917_v51, %v2341_v16  ;;  %1920 = vrcp.f32 %v2368_v48  ;;  %v1919_v58 = vpop.eup %1918  ;;  %v1241_v46 = vsel %vm1238_vm2, %v1240_v47, %v1236_v56  ;;  %v1357_v59 = vand.u32 2147483647, %v2341_v16  ;;  %725 = vst.msk [vmem:[#allocation2 + $0x98] sm:$0xff] %vm336_vm3, %v692_v55  ;;  %v605_v32 = vpop.f32.mrf.mxu0 }
  0xd4   : > { %v788_v61 = vmul.f32 %v2171_v35, %v752_v50  ;;  %v1470_v63 = vmul.f32 %v1241_v46, %v2230_v43  ;;  %v2387_v1 = vadd.f32 1.0, %v1919_v58  ;;  %1922 = vpow2.f32 %v1816_v44  ;;  %v414_v44 = vld [vmem:[#allocation2 + $0x68] sm:$0xff]  ;;  %v625_v55 = vpop.f32.mrf.mxu1 }
  0xd5   : > { %v1350_v0 = vsub.f32 1.0, %v1349_v57  ;;  %vm1353_vm4 = vweird.f32 %v2341_v16  ;;  %v1012_v5 = vand.u32 2147483647, %v2368_v48  ;;  %v1824_v8 = vmul.f32 -1.442695, %v2373_v52 }
  0xd6   : > { %v1801_v10 = vmul.f32 -1.442695, %v2376_v54  ;;  %v1502_v14 = vpack.c.bf16 %v1470_v63, %v1470_v63  ;;  %vm1354_vm5 = vweird.f32 %v1917_v51  ;;  %1924 = vrcp.f32 %v2387_v1 }
  0xd7   : > { %v1351_v15 = vmul.f32 %v1917_v51, %v1350_v0  ;;  %vm2394_vm6 = vcmp.eq.f32.partialorder %v1357_v59, 8.507059e+37  ;;  %v1014_v6 = vand.u32 2147483648, %v2368_v48  ;;  %1926 = vpow2.f32 %v1824_v8  ;;  %vm2409_vm7 = vmor %vm1353_vm4, %vm1354_vm5 }
  0xd8   : > { %v2400_v18 = vadd.f32 %v2176_v42, %v788_v61  ;;  %1535 = vst.msk [vmem:[%s2305_s10 + $0x44] sm:$0xf] %vm1517_vm9, %v1502_v14  ;;  %1928 = vpow2.f32 %v1801_v10  ;;  %v700_v25 = vadd.f32 %v660_v49, %v428_v4  ;;  %v677_v11 = vadd.f32 %v603_v41, %v405_v53 }
  0xd9   : > { %v2402_v9 = vpop.eup %1920  ;;  %v1352_v23 = vadd.f32 %v1917_v51, %v1351_v15  ;;  %v1360_v27 = vor.u32 1.1754944e-38, %v1359_v60  ;;  %vm1008_vm8 = vweird.f32 %v2368_v48  ;;  %vm2416_vm10 = vcmp.eq.f32.partialorder %v1012_v5, 8.507059e+37 }
  0xda   : > { %v1004_v21 = vmul.f32 %v2402_v9, %v2368_v48  ;;  %v1923_v12 = vpop.eup %1922  ;;  %v1809_v33 = vmul.f32 -1.442695, %v2400_v18  ;;  %733 = vst.msk [vmem:[#allocation2 + $0xd8] sm:$0xff] %vm336_vm3, %v700_v25  ;;  %v685_v24 = vadd.f32 %v623_v62, %v413_v19  ;;  %v693_v34 = vadd.f32 %v643_v22, %v421_v20  ;;  %v760_v40 = vld [vmem:[#allocation2 + $0x98] sm:$0xff] }
  0xdb   : > { %v1356_v16 = vsel %vm2409_vm7, %v1917_v51, %v1352_v23  ;;  %v1015_v37 = vor.u32 1.1754944e-38, %v1014_v6  ;;  %v2426_v39 = vadd.f32 1.0, %v1923_v12  ;;  %710 = vst.msk [vmem:[#allocation2 + $0x20] sm:$0xff] %vm336_vm3, %v677_v11  ;;  %v701_v45 = vadd.f32 %v663_v30, %v429_v29 }
  0xdc   : > { %v1361_v36 = vsel %vm2394_vm6, %v1360_v27, %v1356_v16  ;;  %v1005_v13 = vsub.f32 1.0, %v1004_v21  ;;  %v1925_v49 = vpop.eup %1924  ;;  %1930 = vpow2.f32 %v1809_v33  ;;  %718 = vst.msk [vmem:[#allocation2 + $0x60] sm:$0xff] %vm336_vm3, %v685_v24  ;;  %v678_v17 = vadd.f32 %v605_v32, %v406_v31 }
  0xdd   : > { %v1478_v41 = vmul.f32 %v1361_v36, %v2257_v2  ;;  %v1927_v47 = vpop.eup %1926  ;;  %vm1009_vm11 = vweird.f32 %v2402_v9  ;;  %v1124_v51 = vmul.f32 %v1925_v49, %v2387_v1  ;;  %1932 = vrcp.f32 %v2426_v39  ;;  %726 = vst.msk [vmem:[#allocation2 + $0xa0] sm:$0xff] %vm336_vm3, %v693_v34 }
  0xde   : > { %v1006_v50 = vmul.f32 %v2402_v9, %v1005_v13  ;;  %v1929_v2 = vpop.eup %1928  ;;  %v1132_v57 = vand.u32 2147483647, %v2387_v1  ;;  %v1134_v58 = vand.u32 2147483648, %v2387_v1  ;;  %v796_v46 = vmul.f32 %v2171_v35, %v760_v40  ;;  %734 = vst.msk [vmem:[#allocation2 + $0xe0] sm:$0xff] %vm336_vm3, %v701_v45  ;;  %vm1010_vm12 = vmor %vm1008_vm8, %vm1009_vm11 }
  0xdf   : > { %v1510_v56 = vpack.c.bf16 %v1478_v41, %v1478_v41  ;;  %v1125_v60 = vsub.f32 1.0, %v1124_v51  ;;  %v2441_v61 = vadd.f32 1.0, %v1927_v47  ;;  %v2443_v62 = vadd.f32 1.0, %v1929_v2  ;;  %711 = vst.msk [vmem:[#allocation2 + $0x28] sm:$0xff] %vm336_vm3, %v678_v17 }
  0xe0   : > { %v1007_v59 = vadd.f32 %v2402_v9, %v1006_v50  ;;  %vm1128_vm13 = vweird.f32 %v2387_v1  ;;  %v1252_v63 = vand.u32 2147483647, %v2426_v39  ;;  %v1254_v0 = vand.u32 2147483648, %v2426_v39 }
  0xe1   : > { %1543 = vst.msk [vmem:[%s2305_s10 + $0x64] sm:$0xf] %vm1517_vm9, %v1510_v56  ;;  %v686_v4 = vadd.f32 %v625_v55, %v414_v44  ;;  %v1126_v5 = vmul.f32 %v1925_v49, %v1125_v60  ;;  %vm1129_vm14 = vweird.f32 %v1925_v49  ;;  %1934 = vrcp.f32 %v2441_v61  ;;  %v768_v25 = vld [vmem:[#allocation2 + $0xd8] sm:$0xff] }
  0xe2   : > { %v1011_v53 = vsel %vm1010_vm12, %v2402_v9, %v1007_v59  ;;  %v1931_v8 = vpop.eup %1930  ;;  %vm2459_vm15 = vcmp.eq.f32.partialorder %v1132_v57, 8.507059e+37  ;;  %v1135_v14 = vor.u32 1.1754944e-38, %v1134_v58  ;;  %1936 = vrcp.f32 %v2443_v62  ;;  %vm1130_vm1 = vmor %vm1128_vm13, %vm1129_vm14  ;;  %v745_v11 = vld [vmem:[#allocation2 + $0x20] sm:$0xff] }
  0xe3   : > { %v1016_v10 = vsel %vm2416_vm10, %v1015_v37, %v1011_v53  ;;  %719 = vst.msk [vmem:[#allocation2 + $0x68] sm:$0xff] %vm336_vm3, %v686_v4  ;;  %v1933_v15 = vpop.eup %1932  ;;  %v1127_v6 = vadd.f32 %v1925_v49, %v1126_v5  ;;  %vm1248_vm0 = vweird.f32 %v2426_v39  ;;  %v2468_v19 = vadd.f32 %v2176_v42, %v796_v46  ;;  %v753_v44 = vld [vmem:[#allocation2 + $0x60] sm:$0xff] }
  0xe4   : > { %v1455_v43 = vmul.f32 %v1016_v10, %v2260_v3  ;;  %v1244_v20 = vmul.f32 %v1933_v15, %v2426_v39  ;;  %vm2473_vm2 = vcmp.eq.f32.partialorder %v1252_v63, 8.507059e+37  ;;  %v1255_v9 = vor.u32 1.1754944e-38, %v1254_v0  ;;  %v761_v55 = vld [vmem:[#allocation2 + $0xa0] sm:$0xff] }
  0xe5   : > { %v1372_v23 = vand.u32 2147483647, %v2441_v61  ;;  %v1374_v3 = vand.u32 2147483648, %v2441_v61  ;;  %v1131_v27 = vsel %vm1130_vm1, %v1925_v49, %v1127_v6  ;;  %v1027_v21 = vand.u32 2147483647, %v2443_v62 }
  0xe6   : > { %v1487_v26 = vpack.c.bf16 %v1455_v43, %v1455_v43  ;;  %v1029_v1 = vand.u32 2147483648, %v2443_v62  ;;  %v1136_v28 = vsel %vm2459_vm15, %v1135_v14, %v1131_v27  ;;  %v1245_v29 = vsub.f32 1.0, %v1244_v20 }
  0xe7   : > { %vm1249_vm4 = vweird.f32 %v1933_v15  ;;  %vm1368_vm5 = vweird.f32 %v2441_v61  ;;  %v2484_v30 = vadd.f32 1.0, %v1931_v8  ;;  %v1935_v31 = vpop.eup %1934  ;;  %v1463_v32 = vmul.f32 %v1136_v28, %v2264_v7 }
  0xe8   : > { %1520 = vst.msk [vmem:[%s2305_s10 + $0x8] sm:$0xf] %vm1517_vm9, %v1487_v26  ;;  %vm1023_vm6 = vweird.f32 %v2443_v62  ;;  %v1817_v12 = vmul.f32 -1.442695, %v2468_v19  ;;  %v804_v16 = vmul.f32 %v2171_v35, %v768_v25  ;;  %v781_v33 = vmul.f32 %v2171_v35, %v745_v11  ;;  %v1937_v24 = vpop.eup %1936  ;;  %vm1250_vm12 = vmor %vm1248_vm0, %vm1249_vm4 }
  0xe9   : > { %v1246_v34 = vmul.f32 %v1933_v15, %v1245_v29  ;;  %v1364_v36 = vmul.f32 %v1935_v31, %v2441_v61  ;;  %vm2494_vm7 = vcmp.eq.f32.partialorder %v1372_v23, 8.507059e+37  ;;  %v1375_v37 = vor.u32 1.1754944e-38, %v1374_v3 }
  0xea   : > { %1938 = vrcp.f32 %v2484_v30  ;;  %v1495_v7 = vpack.c.bf16 %v1463_v32, %v1463_v32  ;;  %v1019_v40 = vmul.f32 %v1937_v24, %v2443_v62  ;;  %vm2500_vm8 = vcmp.eq.f32.partialorder %v1027_v21, 8.507059e+37 }
  0xeb   : > { %v1030_v41 = vor.u32 1.1754944e-38, %v1029_v1  ;;  %v1247_v45 = vadd.f32 %v1933_v15, %v1246_v34  ;;  %v1365_v17 = vsub.f32 1.0, %v1364_v36  ;;  %vm1369_vm10 = vweird.f32 %v1935_v31 }
  0xec   : > { %vm1024_vm11 = vweird.f32 %v1937_v24  ;;  %1528 = vst.msk [vmem:[%s2305_s10 + $0x28] sm:$0xf] %vm1517_vm9, %v1495_v7  ;;  %v1020_v47 = vsub.f32 1.0, %v1019_v40  ;;  %1940 = vpow2.f32 %v1817_v12  ;;  %v2510_v50 = vadd.f32 %v2176_v42, %v804_v16  ;;  %vm1370_vm13 = vmor %vm1368_vm5, %vm1369_vm10 }
  0xed   : > { %v2513_v51 = vadd.f32 %v2176_v42, %v781_v33  ;;  %v1251_v2 = vsel %vm1250_vm12, %v1933_v15, %v1247_v45  ;;  %v1366_v56 = vmul.f32 %v1935_v31, %v1365_v17  ;;  %v1147_v57 = vand.u32 2147483647, %v2484_v30  ;;  %vm1025_vm15 = vmor %vm1023_vm6, %vm1024_vm11  ;;  %v769_v15 = vld [vmem:[#allocation2 + $0xe0] sm:$0xff] }
  0xee   : > { %v1149_v58 = vand.u32 2147483648, %v2484_v30  ;;  %v1256_v39 = vsel %vm2473_vm2, %v1255_v9, %v1251_v2  ;;  %v1021_v46 = vmul.f32 %v1937_v24, %v1020_v47  ;;  %v1825_v59 = vmul.f32 -1.442695, %v2510_v50 }
  0xef   : > { %v1802_v60 = vmul.f32 -1.442695, %v2513_v51  ;;  %v1471_v0 = vmul.f32 %v1256_v39, %v2362_v38  ;;  %v1367_v4 = vadd.f32 %v1935_v31, %v1366_v56  ;;  %v789_v53 = vmul.f32 %v2171_v35, %v753_v44 }
  0xf0   : > { %v1939_v63 = vpop.eup %1938  ;;  %v797_v5 = vmul.f32 %v2171_v35, %v761_v55  ;;  %v1022_v8 = vadd.f32 %v1937_v24, %v1021_v46  ;;  %1942 = vpow2.f32 %v1825_v59  ;;  %v805_v27 = vmul.f32 %v2171_v35, %v769_v15  ;;  %v645_v15 = vpop.f32.mrf.mxu2 }
  0xf1   : > { %v1139_v10 = vmul.f32 %v1939_v63, %v2484_v30  ;;  %vm1144_vm14 = vweird.f32 %v1939_v63  ;;  %v1503_v48 = vpack.c.bf16 %v1471_v0, %v1471_v0  ;;  %v1371_v14 = vsel %vm1370_vm13, %v1935_v31, %v1367_v4  ;;  %v754_v0 = vld [vmem:[#allocation2 + $0x68] sm:$0xff] }
  0xf2   : > { %1944 = vpow2.f32 %v1802_v60  ;;  %v2532_v38 = vadd.f32 %v2176_v42, %v789_v53  ;;  %v1941_v43 = vpop.eup %1940  ;;  %v1376_v61 = vsel %vm2494_vm7, %v1375_v37, %v1371_v14  ;;  %v1026_v6 = vsel %vm1025_vm15, %v1937_v24, %v1022_v8 }
  0xf3   : > { %v1140_v20 = vsub.f32 1.0, %v1139_v10  ;;  %v2537_v22 = vadd.f32 %v2176_v42, %v797_v5  ;;  %1536 = vst.msk [vmem:[%s2305_s10 + $0x48] sm:$0xf] %vm1517_vm9, %v1503_v48  ;;  %v1479_v9 = vmul.f32 %v1376_v61, %v2373_v52  ;;  %v1031_v62 = vsel %vm2500_vm8, %v1030_v41, %v1026_v6  ;;  %v430_v5 = vld [vmem:[#allocation2 + $0xe8] sm:$0xff] }
  0xf4   : > { %v2544_v23 = vadd.f32 1.0, %v1941_v43  ;;  %v1810_v3 = vmul.f32 -1.442695, %v2532_v38  ;;  %v1456_v25 = vmul.f32 %v1031_v62, %v2376_v54  ;;  %vm1143_vm0 = vweird.f32 %v2484_v30  ;;  %v746_v30 = vld [vmem:[#allocation2 + $0x28] sm:$0xff]  ;;  %v2617_v62 = vpop.f32.mrf.mxu3 }
  0xf5   : > { %v1141_v11 = vmul.f32 %v1939_v63, %v1140_v20  ;;  %v1818_v26 = vmul.f32 -1.442695, %v2537_v22  ;;  %v1511_v21 = vpack.c.bf16 %v1479_v9, %v1479_v9  ;;  %vm1145_vm1 = vmor %vm1143_vm0, %vm1144_vm14  ;;  %v1150_v54 = vor.u32 1.1754944e-38, %v1149_v58  ;;  %v2614_v20 = vld [vmem:[%s2898_s2] ss:$0 sm:$0xff] }
  0xf6   : > { %1946 = vrcp.f32 %v2544_v23  ;;  %v1943_v52 = vpop.eup %1942  ;;  %v1488_v1 = vpack.c.bf16 %v1456_v25, %v1456_v25  ;;  %v2558_v32 = vadd.f32 %v2176_v42, %v805_v27  ;;  %vm1148_vm2 = vcmp.eq.f32.partialorder %v1147_v57, 8.507059e+37 }
  0xf7   : > { %v1142_v28 = vadd.f32 %v1939_v63, %v1141_v11  ;;  %1948 = vpow2.f32 %v1810_v3  ;;  %1544 = vst.msk [vmem:[%s2305_s10 + $0x68] sm:$0xf] %vm1517_vm9, %v1511_v21  ;;  %v2555_v31 = vadd.f32 1.0, %v1943_v52  ;;  %v1267_v34 = vand.u32 2147483647, %v2544_v23 }
  0xf8   : > { %v1945_v29 = vpop.eup %1944  ;;  %1950 = vpow2.f32 %v1818_v26  ;;  %1521 = vst.msk [vmem:[%s2305_s10 + $0xc] sm:$0xf] %vm1517_vm9, %v1488_v1  ;;  %v1269_v36 = vand.u32 2147483648, %v2544_v23  ;;  %vm1263_vm4 = vweird.f32 %v2544_v23  ;;  %v1826_v37 = vmul.f32 -1.442695, %v2558_v32 }
  0xf9   : > { %v1146_v12 = vsel %vm1145_vm1, %v1939_v63, %v1142_v28  ;;  %v2562_v16 = vadd.f32 1.0, %v1945_v29  ;;  %1952 = vrcp.f32 %v2555_v31  ;;  %v782_v7 = vmul.f32 %v2171_v35, %v746_v30 }
  0xfa   : > { %v1151_v33 = vsel %vm1148_vm2, %v1150_v54, %v1146_v12  ;;  %v1389_v45 = vand.u32 2147483648, %v2555_v31  ;;  %vm2581_vm5 = vcmp.eq.f32.partialorder %v1267_v34, 8.507059e+37  ;;  %v1270_v56 = vor.u32 1.1754944e-38, %v1269_v36 }
  0xfb   : > { %v1464_v24 = vmul.f32 %v1151_v33, %v2400_v18  ;;  %1954 = vrcp.f32 %v2562_v16  ;;  %v1387_v18 = vand.u32 2147483647, %v2555_v31  ;;  %v1042_v47 = vand.u32 2147483647, %v2562_v16 }
  0xfc   : > { %v1947_v13 = vpop.eup %1946  ;;  %v1044_v44 = vand.u32 2147483648, %v2562_v16  ;;  %1956 = vpow2.f32 %v1826_v37  ;;  %vm1383_vm6 = vweird.f32 %v2555_v31  ;;  %vm1038_vm7 = vweird.f32 %v2562_v16 }
  0xfd   : > { %v1949_v40 = vpop.eup %1948  ;;  %v1496_v49 = vpack.c.bf16 %v1464_v24, %v1464_v24  ;;  %v1259_v41 = vmul.f32 %v1947_v13, %v2544_v23  ;;  %v2591_v39 = vadd.f32 %v2176_v42, %v782_v7  ;;  %vm1264_vm8 = vweird.f32 %v1947_v13 }
  0xfe   : > { %v1951_v17 = vpop.eup %1950  ;;  %v2577_v55 = vadd.f32 1.0, %v1949_v40  ;;  %vm2594_vm10 = vcmp.eq.f32.partialorder %v1387_v18, 8.507059e+37  ;;  %v1390_v4 = vor.u32 1.1754944e-38, %v1389_v45  ;;  %vm2600_vm11 = vcmp.eq.f32.partialorder %v1042_v47, 8.507059e+37  ;;  %vm1265_vm12 = vmor %vm1263_vm4, %vm1264_vm8  ;;  %v422_v45 = vld [vmem:[#allocation2 + $0xa8] sm:$0xff] }
  0xff   : > { %1529 = vst.msk [vmem:[%s2305_s10 + $0x2c] sm:$0xf] %vm1517_vm9, %v1496_v49  ;;  %v1260_v2 = vsub.f32 1.0, %v1259_v41  ;;  %v2585_v57 = vadd.f32 1.0, %v1951_v17  ;;  %v1953_v58 = vpop.eup %1952  ;;  %v1045_v42 = vor.u32 1.1754944e-38, %v1044_v44  ;;  %v790_v9 = vmul.f32 %v2614_v20, %v754_v0  ;;  %v608_v49 = vpop.f32.mrf.mxu0 }
 0x100   : > { %1958 = vrcp.f32 %v2577_v55  ;;  %v1379_v60 = vmul.f32 %v1953_v58, %v2555_v31  ;;  %v1162_v48 = vand.u32 2147483647, %v2577_v55  ;;  %v1164_v14 = vand.u32 2147483648, %v2577_v55  ;;  %v628_v17 = vpop.f32.mrf.mxu1  ;;  %v668_v0 = vpop.f32.mrf.mxu3 }
 0x101   : > { %v1955_v46 = vpop.eup %1954  ;;  %v1261_v59 = vmul.f32 %v1947_v13, %v1260_v2  ;;  %1960 = vrcp.f32 %v2585_v57  ;;  %vm1158_vm13 = vweird.f32 %v2577_v55  ;;  %v1803_v6 = vmul.f32 -1.442695, %v2591_v39 }
 0x102   : > { %v1034_v53 = vmul.f32 %v1955_v46, %v2562_v16  ;;  %v1380_v10 = vsub.f32 1.0, %v1379_v60  ;;  %v1957_v43 = vpop.eup %1956  ;;  %vm1384_vm14 = vweird.f32 %v1953_v58  ;;  %vm1039_vm15 = vweird.f32 %v1955_v46 }
 0x103   : > { %v1262_v8 = vadd.f32 %v1947_v13, %v1261_v59  ;;  %v2619_v11 = vadd.f32 1.0, %v1957_v43  ;;  %1962 = vpow2.f32 %v1803_v6  ;;  %vm2625_vm0 = vcmp.eq.f32.partialorder %v1162_v48, 8.507059e+37  ;;  %vm1385_vm1 = vmor %vm1383_vm6, %vm1384_vm14 }
 0x104   : > { %v1035_v61 = vsub.f32 1.0, %v1034_v53  ;;  %v1381_v25 = vmul.f32 %v1953_v58, %v1380_v10  ;;  %v1165_v54 = vor.u32 1.1754944e-38, %v1164_v14  ;;  %vm1040_vm2 = vmor %vm1038_vm7, %vm1039_vm15  ;;  %v1282_v36 = vand.u32 2147483647, %v2585_v57 }
 0x105   : > { %v1266_v3 = vsel %vm1265_vm12, %v1947_v13, %v1262_v8  ;;  %1964 = vrcp.f32 %v2619_v11  ;;  %v1284_v40 = vand.u32 2147483648, %v2585_v57  ;;  %vm1278_vm6 = vweird.f32 %v2585_v57  ;;  %v407_v8 = vld [vmem:[#allocation2 + $0x30] sm:$0xff] }
 0x106   : > { %v1959_v23 = vpop.eup %1958  ;;  %v1271_v26 = vsel %vm2581_vm5, %v1270_v56, %v1266_v3  ;;  %v1036_v27 = vmul.f32 %v1955_v46, %v1035_v61  ;;  %v1382_v1 = vadd.f32 %v1953_v58, %v1381_v25  ;;  %v694_v63 = vadd.f32 %v645_v15, %v422_v45  ;;  %v415_v15 = vld [vmem:[#allocation2 + $0x70] sm:$0xff] }
 0x107   : > { %v1961_v21 = vpop.eup %1960  ;;  %v1472_v52 = vmul.f32 %v1271_v26, %v2468_v19  ;;  %v1154_v28 = vmul.f32 %v1959_v23, %v2577_v55  ;;  %v2636_v19 = vld [vmem:[%s2899_s3] ss:$0 sm:$0xff]  ;;  %vm1159_vm4 = vweird.f32 %v1959_v23  ;;  %v1402_v61 = vand.u32 2147483647, %v2619_v11  ;;  %v423_v3 = vld [vmem:[#allocation2 + $0xb0] sm:$0xff] }
 0x108   : > { %v1037_v12 = vadd.f32 %v1955_v46, %v1036_v27  ;;  %v1274_v30 = vmul.f32 %v1961_v21, %v2585_v57  ;;  %v2639_v33 = vadd.f32 %v2636_v19, %v790_v9  ;;  %v1386_v34 = vsel %vm1385_vm1, %v1953_v58, %v1382_v1  ;;  %vm1160_vm7 = vmor %vm1158_vm13, %vm1159_vm4  ;;  %727 = vst.msk [vmem:[#allocation2 + $0xa8] sm:$0xff] %vm336_vm3, %v694_v63  ;;  %v610_v1 = vpop.f32.mrf.mxu0 }
 0x109   : > { %v1504_v24 = vpack.c.bf16 %v1472_v52, %v1472_v52  ;;  %v1155_v31 = vsub.f32 1.0, %v1154_v28  ;;  %v1391_v13 = vsel %vm2594_vm10, %v1390_v4, %v1386_v34  ;;  %v1963_v47 = vpop.eup %1962  ;;  %vm1279_vm5 = vweird.f32 %v1961_v21 }
 0x10a   : > { %v1041_v37 = vsel %vm1040_vm2, %v1955_v46, %v1037_v12  ;;  %v1275_v7 = vsub.f32 1.0, %v1274_v30  ;;  %v1480_v41 = vmul.f32 %v1391_v13, %v2510_v50  ;;  %v1811_v35 = vmul.f32 -1.442695, %v2639_v33  ;;  %v648_v46 = vpop.f32.mrf.mxu2  ;;  %vm1280_vm8 = vmor %vm1278_vm6, %vm1279_vm5  ;;  %v416_v12 = vld [vmem:[#allocation2 + $0x78] sm:$0xff]  ;;  %v630_v30 = vpop.f32.mrf.mxu1 }
 0x10b   : > { %1537 = vst.msk [vmem:[%s2305_s10 + $0x4c] sm:$0xf] %vm1517_vm9, %v1504_v24  ;;  %v1046_v18 = vsel %vm2600_vm11, %v1045_v42, %v1041_v37  ;;  %v1156_v16 = vmul.f32 %v1959_v23, %v1155_v31  ;;  %v2656_v50 = vadd.f32 1.0, %v1963_v47  ;;  %v1965_v59 = vpop.eup %1964  ;;  %v1285_v57 = vor.u32 1.1754944e-38, %v1284_v40  ;;  %v424_v13 = vld [vmem:[#allocation2 + $0xb8] sm:$0xff] }
 0x10c   : > { %v1457_v44 = vmul.f32 %v1046_v18, %v2513_v51  ;;  %v1276_v2 = vmul.f32 %v1961_v21, %v1275_v7  ;;  %v1512_v56 = vpack.c.bf16 %v1480_v41, %v1480_v41  ;;  %1966 = vpow2.f32 %v1811_v35  ;;  %v432_v18 = vld [vmem:[#allocation2 + $0xf8] sm:$0xff] }
 0x10d   : > { %v1157_v58 = vadd.f32 %v1959_v23, %v1156_v16  ;;  %v1394_v53 = vmul.f32 %v1965_v59, %v2619_v11  ;;  %1968 = vrcp.f32 %v2656_v50  ;;  %vm1283_vm10 = vcmp.eq.f32.partialorder %v1282_v36, 8.507059e+37  ;;  %v670_v16 = vpop.f32.mrf.mxu3 }
 0x10e   : > { %v1489_v60 = vpack.c.bf16 %v1457_v44, %v1457_v44  ;;  %v1277_v51 = vadd.f32 %v1961_v21, %v1276_v2  ;;  %1545 = vst.msk [vmem:[%s2305_s10 + $0x6c] sm:$0xf] %vm1517_vm9, %v1512_v56  ;;  %v1404_v6 = vand.u32 2147483648, %v2619_v11  ;;  %v702_v9 = vadd.f32 %v2617_v62, %v430_v5 }
 0x10f   : > { %v1161_v4 = vsel %vm1160_vm7, %v1959_v23, %v1157_v58  ;;  %v1395_v14 = vsub.f32 1.0, %v1394_v53  ;;  %vm1399_vm11 = vweird.f32 %v1965_v59  ;;  %v679_v26 = vadd.f32 %v608_v49, %v407_v8  ;;  %v762_v49 = vld [vmem:[#allocation2 + $0xa8] sm:$0xff] }
 0x110   : > { %1522 = vst.msk [vmem:[%s2305_s10 + $0x10] sm:$0xf] %vm1517_vm9, %v1489_v60  ;;  %v1166_v55 = vsel %vm2625_vm0, %v1165_v54, %v1161_v4  ;;  %v1281_v42 = vsel %vm1280_vm8, %v1961_v21, %v1277_v51  ;;  %v687_v52 = vadd.f32 %v628_v17, %v415_v15  ;;  %vm1398_vm12 = vweird.f32 %v2619_v11 }
 0x111   : > { %v1465_v10 = vmul.f32 %v1166_v55, %v2532_v38  ;;  %v1286_v48 = vsel %vm1283_vm10, %v1285_v57, %v1281_v42  ;;  %v1396_v23 = vmul.f32 %v1965_v59, %v1395_v14  ;;  %v431_v38 = vld [vmem:[#allocation2 + $0xf0] sm:$0xff]  ;;  %735 = vst.msk [vmem:[#allocation2 + $0xe8] sm:$0xff] %vm336_vm3, %v702_v9  ;;  %v695_v54 = vadd.f32 %v648_v46, %v423_v3  ;;  %vm1400_vm13 = vmor %vm1398_vm12, %vm1399_vm11 }
 0x112   : > { %v1473_v43 = vmul.f32 %v1286_v48, %v2537_v22  ;;  %v1967_v27 = vpop.eup %1966  ;;  %v408_v22 = vld [vmem:[#allocation2 + $0x38] sm:$0xff]  ;;  %v1405_v24 = vor.u32 1.1754944e-38, %v1404_v6  ;;  %v703_v31 = vadd.f32 %v668_v0, %v431_v38  ;;  %vm1403_vm14 = vcmp.eq.f32.partialorder %v1402_v61, 8.507059e+37  ;;  %712 = vst.msk [vmem:[#allocation2 + $0x30] sm:$0xff] %vm336_vm3, %v679_v26  ;;  %v650_v37 = vpop.f32.mrf.mxu2 }
 0x113   : > { %v1497_v25 = vpack.c.bf16 %v1465_v10, %v1465_v10  ;;  %v1969_v28 = vpop.eup %1968  ;;  %v1397_v29 = vadd.f32 %v1965_v59, %v1396_v23  ;;  %v2680_v62 = vadd.f32 1.0, %v1967_v27  ;;  %v680_v11 = vadd.f32 %v610_v1, %v408_v22  ;;  %720 = vst.msk [vmem:[#allocation2 + $0x70] sm:$0xff] %vm336_vm3, %v687_v52 }
 0x114   : > { %v1505_v21 = vpack.c.bf16 %v1473_v43, %v1473_v43  ;;  %v1049_v34 = vmul.f32 %v1969_v28, %v2656_v50  ;;  %v688_v41 = vadd.f32 %v630_v30, %v416_v12  ;;  %v1057_v17 = vand.u32 2147483647, %v2656_v50  ;;  %728 = vst.msk [vmem:[#allocation2 + $0xb0] sm:$0xff] %vm336_vm3, %v695_v54 }
 0x115   : > { %1530 = vst.msk [vmem:[%s2305_s10 + $0x30] sm:$0xf] %vm1517_vm9, %v1497_v25  ;;  %v1401_v36 = vsel %vm1400_vm13, %v1965_v59, %v1397_v29  ;;  %1970 = vrcp.f32 %v2680_v62  ;;  %v1059_v47 = vand.u32 2147483648, %v2656_v50  ;;  %v798_v44 = vmul.f32 %v2614_v20, %v762_v49 }
 0x116   : > { %1538 = vst.msk [vmem:[%s2305_s10 + $0x50] sm:$0xf] %vm1517_vm9, %v1505_v21  ;;  %v1406_v7 = vsel %vm1403_vm14, %v1405_v24, %v1401_v36  ;;  %v1050_v40 = vsub.f32 1.0, %v1049_v34  ;;  %vm1054_vm15 = vweird.f32 %v1969_v28  ;;  %v696_v35 = vadd.f32 %v650_v37, %v424_v13 }
 0x117   : > { %v1481_v45 = vmul.f32 %v1406_v7, %v2558_v32  ;;  %736 = vst.msk [vmem:[#allocation2 + $0xf0] sm:$0xff] %vm336_vm3, %v703_v31  ;;  %v2696_v58 = vadd.f32 %v2636_v19, %v798_v44  ;;  %v704_v32 = vadd.f32 %v670_v16, %v432_v18  ;;  %vm1053_vm0 = vweird.f32 %v2656_v50 }
 0x118   : > { %v1051_v2 = vmul.f32 %v1969_v28, %v1050_v40  ;;  %v770_v46 = vld [vmem:[#allocation2 + $0xe8] sm:$0xff]  ;;  %713 = vst.msk [vmem:[#allocation2 + $0x38] sm:$0xff] %vm336_vm3, %v680_v11  ;;  %vm1055_vm1 = vmor %vm1053_vm0, %vm1054_vm15  ;;  %vm1058_vm2 = vcmp.eq.f32.partialorder %v1057_v17, 8.507059e+37  ;;  %v1060_v63 = vor.u32 1.1754944e-38, %v1059_v47  ;;  %vm1173_vm4 = vweird.f32 %v2680_v62 }
 0x119   : > { %v1513_v56 = vpack.c.bf16 %v1481_v45, %v1481_v45  ;;  %v806_v60 = vmul.f32 %v2614_v20, %v770_v46  ;;  %721 = vst.msk [vmem:[#allocation2 + $0x78] sm:$0xff] %vm336_vm3, %v688_v41  ;;  %v1819_v0 = vmul.f32 -1.442695, %v2696_v58  ;;  %v747_v50 = vld [vmem:[#allocation2 + $0x30] sm:$0xff]  ;;  %v1179_v55 = vand.u32 2147483648, %v2680_v62 }
 0x11a   : > { %v1052_v59 = vadd.f32 %v1969_v28, %v1051_v2  ;;  %729 = vst.msk [vmem:[#allocation2 + $0xb8] sm:$0xff] %vm336_vm3, %v696_v35  ;;  %v783_v42 = vmul.f32 %v2614_v20, %v747_v50  ;;  %v755_v8 = vld [vmem:[#allocation2 + $0x70] sm:$0xff]  ;;  %v1177_v61 = vand.u32 2147483647, %v2680_v62 }
 0x11b   : > { %v1971_v51 = vpop.eup %1970  ;;  %1546 = vst.msk [vmem:[%s2305_s10 + $0x70] sm:$0xf] %vm1517_vm9, %v1513_v56  ;;  %v2708_v53 = vadd.f32 %v2636_v19, %v806_v60  ;;  %1972 = vpow2.f32 %v1819_v0  ;;  %v791_v15 = vmul.f32 %v2614_v20, %v755_v8  ;;  %v763_v43 = vld [vmem:[#allocation2 + $0xb0] sm:$0xff] }
 0x11c   : > { %v1056_v4 = vsel %vm1055_vm1, %v1969_v28, %v1052_v59  ;;  %v1169_v57 = vmul.f32 %v1971_v51, %v2680_v62  ;;  %737 = vst.msk [vmem:[#allocation2 + $0xf8] sm:$0xff] %vm336_vm3, %v704_v32  ;;  %vm1174_vm5 = vweird.f32 %v1971_v51  ;;  %v2719_v6 = vadd.f32 %v2636_v19, %v783_v42 }
 0x11d   : > { %v1061_v5 = vsel %vm1058_vm2, %v1060_v63, %v1056_v4  ;;  %v1827_v14 = vmul.f32 -1.442695, %v2708_v53  ;;  %v799_v9 = vmul.f32 %v2614_v20, %v763_v43  ;;  %v1180_v28 = vor.u32 1.1754944e-38, %v1179_v55  ;;  %vm1175_vm3 = vmor %vm1173_vm4, %vm1174_vm5 }
 0x11e   : > { %v1458_v10 = vmul.f32 %v1061_v5, %v2591_v39  ;;  %v1170_v48 = vsub.f32 1.0, %v1169_v57  ;;  %v771_v3 = vld [vmem:[#allocation2 + $0xf0] sm:$0xff]  ;;  %v2723_v39 = vadd.f32 %v2636_v19, %v791_v15  ;;  %v1804_v38 = vmul.f32 -1.442695, %v2719_v6 }
 0x11f   : > { %1974 = vpow2.f32 %v1827_v14  ;;  %v748_v26 = vld [vmem:[#allocation2 + $0x38] sm:$0xff]  ;;  %v2727_v27 = vadd.f32 %v2636_v19, %v799_v9  ;;  %v807_v21 = vmul.f32 %v2614_v20, %v771_v3  ;;  %vm1178_vm6 = vcmp.eq.f32.partialorder %v1177_v61, 8.507059e+37 }
 0x120   : > { %v1490_v25 = vpack.c.bf16 %v1458_v10, %v1458_v10  ;;  %v1171_v23 = vmul.f32 %v1971_v51, %v1170_v48  ;;  %v784_v52 = vmul.f32 %v2614_v20, %v748_v26  ;;  %v756_v22 = vld [vmem:[#allocation2 + $0x78] sm:$0xff]  ;;  %v1812_v29 = vmul.f32 -1.442695, %v2723_v39 }
 0x121   : > { %v792_v54 = vmul.f32 %v2614_v20, %v756_v22  ;;  %v1973_v12 = vpop.eup %1972  ;;  %1976 = vpow2.f32 %v1804_v38  ;;  %v1820_v30 = vmul.f32 -1.442695, %v2727_v27  ;;  %v2740_v24 = vadd.f32 %v2636_v19, %v807_v21  ;;  %v764_v41 = vld [vmem:[#allocation2 + $0xb8] sm:$0xff] }
 0x122   : > { %1523 = vst.msk [vmem:[%s2305_s10 + $0x14] sm:$0xf] %vm1517_vm9, %v1490_v25  ;;  %v1172_v1 = vadd.f32 %v1971_v51, %v1171_v23  ;;  %v2743_v34 = vadd.f32 %v2636_v19, %v784_v52  ;;  %v2745_v36 = vadd.f32 1.0, %v1973_v12  ;;  %1978 = vpow2.f32 %v1812_v29 }
 0x123   : > { %1980 = vpow2.f32 %v1820_v30  ;;  %v1828_v62 = vmul.f32 -1.442695, %v2740_v24  ;;  %v2751_v7 = vadd.f32 %v2636_v19, %v792_v54  ;;  %v800_v2 = vmul.f32 %v2614_v20, %v764_v41  ;;  %v772_v4 = vld [vmem:[#allocation2 + $0xf8] sm:$0xff] }
 0x124   : > { %v1176_v31 = vsel %vm1175_vm3, %v1971_v51, %v1172_v1  ;;  %1982 = vrcp.f32 %v2745_v36  ;;  %v1805_v49 = vmul.f32 -1.442695, %v2743_v34  ;;  %v1297_v45 = vand.u32 2147483647, %v2745_v36 }
 0x125   : > { %v1181_v11 = vsel %vm1178_vm6, %v1180_v28, %v1176_v31  ;;  %v1975_v13 = vpop.eup %1974  ;;  %1984 = vpow2.f32 %v1828_v62  ;;  %v1299_v17 = vand.u32 2147483648, %v2745_v36  ;;  %v1813_v44 = vmul.f32 -1.442695, %v2751_v7 }
 0x126   : > { %v1466_v37 = vmul.f32 %v1181_v11, %v2639_v33  ;;  %v2753_v40 = vadd.f32 1.0, %v1975_v13  ;;  %vm1293_vm7 = vweird.f32 %v2745_v36  ;;  %vm2771_vm8 = vcmp.eq.f32.partialorder %v1297_v45, 8.507059e+37 }
 0x127   : > { %v1977_v16 = vpop.eup %1976  ;;  %v1300_v63 = vor.u32 1.1754944e-38, %v1299_v17  ;;  %v2780_v50 = vadd.f32 %v2636_v19, %v800_v2  ;;  %v2795_v61 = vmul.f32 %v2614_v20, %v772_v4 }
 0x128   : > { %v1498_v18 = vpack.c.bf16 %v1466_v37, %v1466_v37  ;;  %1986 = vrcp.f32 %v2753_v40  ;;  %v1979_v33 = vpop.eup %1978  ;;  %v2761_v47 = vadd.f32 1.0, %v1977_v16  ;;  %v1417_v32 = vand.u32 2147483647, %v2753_v40 }
 0x129   : > { %v1981_v35 = vpop.eup %1980  ;;  %v2765_v56 = vadd.f32 1.0, %v1979_v33  ;;  %1988 = vpow2.f32 %v1805_v49  ;;  %v1419_v0 = vand.u32 2147483648, %v2753_v40  ;;  %vm1413_vm10 = vweird.f32 %v2753_v40 }
 0x12a   : > { %1531 = vst.msk [vmem:[%s2305_s10 + $0x34] sm:$0xf] %vm1517_vm9, %v1498_v18  ;;  %v1983_v46 = vpop.eup %1982  ;;  %1990 = vrcp.f32 %v2761_v47  ;;  %v1072_v57 = vand.u32 2147483647, %v2761_v47  ;;  %v1074_v42 = vand.u32 2147483648, %v2761_v47  ;;  %v2783_v8 = vadd.f32 1.0, %v1981_v35 }
 0x12b   : > { %v1985_v59 = vpop.eup %1984  ;;  %v1289_v60 = vmul.f32 %v1983_v46, %v2745_v36  ;;  %1992 = vrcp.f32 %v2765_v56  ;;  %vm2788_vm11 = vcmp.eq.f32.partialorder %v1417_v32, 8.507059e+37  ;;  %v1192_v15 = vand.u32 2147483647, %v2765_v56 }
 0x12c   : > { %1994 = vpow2.f32 %v1813_v44  ;;  %v2785_v10 = vadd.f32 1.0, %v1985_v59  ;;  %v1194_v43 = vand.u32 2147483648, %v2765_v56  ;;  %vm1294_vm12 = vweird.f32 %v1983_v46 }
 0x12d   : > { %v1290_v55 = vsub.f32 1.0, %v1289_v60  ;;  %v1420_v25 = vor.u32 1.1754944e-38, %v1419_v0  ;;  %1996 = vrcp.f32 %v2783_v8  ;;  %vm1068_vm13 = vweird.f32 %v2761_v47  ;;  %vm1295_vm1 = vmor %vm1293_vm7, %vm1294_vm12 }
 0x12e   : > { %v1987_v5 = vpop.eup %1986  ;;  %vm1188_vm14 = vweird.f32 %v2765_v56  ;;  %1998 = vrcp.f32 %v2785_v10  ;;  %vm2802_vm0 = vcmp.eq.f32.partialorder %v1072_v57, 8.507059e+37  ;;  %v1075_v22 = vor.u32 1.1754944e-38, %v1074_v42 }
 0x12f   : > { %v1409_v48 = vmul.f32 %v1987_v5, %v2753_v40  ;;  %v1989_v9 = vpop.eup %1988  ;;  %v1291_v3 = vmul.f32 %v1983_v46, %v1290_v55  ;;  %vm1414_vm15 = vweird.f32 %v1987_v5  ;;  %vm2810_vm2 = vcmp.eq.f32.partialorder %v1192_v15, 8.507059e+37 }
 0x130   : > { %v1991_v23 = vpop.eup %1990  ;;  %v1195_v12 = vor.u32 1.1754944e-38, %v1194_v43  ;;  %v1312_v11 = vand.u32 2147483647, %v2783_v8  ;;  %v1314_v62 = vand.u32 2147483648, %v2783_v8  ;;  %vm1308_vm5 = vweird.f32 %v2783_v8  ;;  %vm1415_vm3 = vmor %vm1413_vm10, %vm1414_vm15 }
 0x131   : > { %v1410_v26 = vsub.f32 1.0, %v1409_v48  ;;  %v1993_v38 = vpop.eup %1992  ;;  %v1292_v21 = vadd.f32 %v1983_v46, %v1291_v3  ;;  %v1064_v20 = vmul.f32 %v1991_v23, %v2761_v47  ;;  %vm1069_vm4 = vweird.f32 %v1991_v23 }
 0x132   : > { %v1995_v1 = vpop.eup %1994  ;;  %v1184_v29 = vmul.f32 %v1993_v38, %v2765_v56  ;;  %vm1189_vm6 = vweird.f32 %v1993_v38  ;;  %vm1428_vm7 = vweird.f32 %v2785_v10  ;;  %v2824_v16 = vadd.f32 1.0, %v1989_v9 }
 0x133   : > { %v1411_v28 = vmul.f32 %v1987_v5, %v1410_v26  ;;  %v1296_v30 = vsel %vm1295_vm1, %v1983_v46, %v1292_v21  ;;  %v1065_v31 = vsub.f32 1.0, %v1064_v20  ;;  %v1997_v49 = vpop.eup %1996  ;;  %v1432_v2 = vand.u32 2147483647, %v2785_v10  ;;  %vm1190_vm10 = vmor %vm1188_vm14, %vm1189_vm6 }
 0x134   : > { %v1301_v13 = vsel %vm2771_vm8, %v1300_v63, %v1296_v30  ;;  %v1185_v36 = vsub.f32 1.0, %v1184_v29  ;;  %v1999_v45 = vpop.eup %1998  ;;  %v1304_v44 = vmul.f32 %v1997_v49, %v2783_v8  ;;  %vm1070_vm8 = vmor %vm1068_vm13, %vm1069_vm4  ;;  %v1434_v51 = vand.u32 2147483648, %v2785_v10 }
 0x135   : > { %v1412_v37 = vadd.f32 %v1987_v5, %v1411_v28  ;;  %v1474_v41 = vmul.f32 %v1301_v13, %v2696_v58  ;;  %v1066_v18 = vmul.f32 %v1991_v23, %v1065_v31  ;;  %v1424_v46 = vmul.f32 %v1999_v45, %v2785_v10 }
 0x136   : > { %v1186_v33 = vmul.f32 %v1993_v38, %v1185_v36  ;;  %v1305_v60 = vsub.f32 1.0, %v1304_v44  ;;  %2000 = vrcp.f32 %v2824_v16  ;;  %vm1429_vm12 = vweird.f32 %v1999_v45 }
 0x137   : > { %v1416_v17 = vsel %vm1415_vm3, %v1987_v5, %v1412_v37  ;;  %v1506_v35 = vpack.c.bf16 %v1474_v41, %v1474_v41  ;;  %v1067_v40 = vadd.f32 %v1991_v23, %v1066_v18  ;;  %v1425_v0 = vsub.f32 1.0, %v1424_v46  ;;  %vm1430_vm15 = vmor %vm1428_vm7, %vm1429_vm12 }
 0x138   : > { %v1421_v58 = vsel %vm2788_vm11, %v1420_v25, %v1416_v17  ;;  %v1187_v59 = vadd.f32 %v1993_v38, %v1186_v33  ;;  %vm1309_vm11 = vweird.f32 %v1997_v49  ;;  %v1306_v57 = vmul.f32 %v1997_v49, %v1305_v60 }
 0x139   : > { %v1482_v32 = vmul.f32 %v1421_v58, %v2708_v53  ;;  %1539 = vst.msk [vmem:[%s2305_s10 + $0x54] sm:$0xf] %vm1517_vm9, %v1506_v35  ;;  %v1071_v63 = vsel %vm1070_vm8, %v1991_v23, %v1067_v40  ;;  %v1426_v42 = vmul.f32 %v1999_v45, %v1425_v0  ;;  %vm1313_vm13 = vcmp.eq.f32.partialorder %v1312_v11, 8.507059e+37  ;;  %vm1310_vm14 = vmor %vm1308_vm5, %vm1309_vm11 }
 0x13a   : > { %v1076_v47 = vsel %vm2802_vm0, %v1075_v22, %v1071_v63  ;;  %v1191_v4 = vsel %vm1190_vm10, %v1993_v38, %v1187_v59  ;;  %v1307_v48 = vadd.f32 %v1997_v49, %v1306_v57  ;;  %v956_v14 = vadd.f32 1.0, %v1995_v1 }
 0x13b   : > { %v1514_v53 = vpack.c.bf16 %v1482_v32, %v1482_v32  ;;  %v1459_v5 = vmul.f32 %v1076_v47, %v2719_v6  ;;  %v1196_v55 = vsel %vm2810_vm2, %v1195_v12, %v1191_v4  ;;  %v1315_v6 = vor.u32 1.1754944e-38, %v1314_v62 }
 0x13c   : > { %v1467_v56 = vmul.f32 %v1196_v55, %v2723_v39  ;;  %v1427_v43 = vadd.f32 %v1999_v45, %v1426_v42  ;;  %v1821_v9 = vmul.f32 -1.442695, %v2780_v50  ;;  %v1311_v25 = vsel %vm1310_vm14, %v1997_v49, %v1307_v48  ;;  %v2001_v39 = vpop.eup %2000 }
 0x13d   : > { %1547 = vst.msk [vmem:[%s2305_s10 + $0x74] sm:$0xf] %vm1517_vm9, %v1514_v53  ;;  %v1491_v15 = vpack.c.bf16 %v1459_v5, %v1459_v5  ;;  %v1435_v23 = vor.u32 1.1754944e-38, %v1434_v51  ;;  %2002 = vrcp.f32 %v956_v14  ;;  %v1316_v26 = vsel %vm1313_vm13, %v1315_v6, %v1311_v25 }
 0x13e   : > { %v1499_v3 = vpack.c.bf16 %v1467_v56, %v1467_v56  ;;  %v1431_v38 = vsel %vm1430_vm15, %v1999_v45, %v1427_v43  ;;  %vm1433_vm0 = vcmp.eq.f32.partialorder %v1432_v2, 8.507059e+37  ;;  %v1475_v8 = vmul.f32 %v1316_v26, %v2727_v27 }
 0x13f   : > { %1524 = vst.msk [vmem:[%s2305_s10 + $0x18] sm:$0xf] %vm1517_vm9, %v1491_v15  ;;  %v1436_v21 = vsel %vm1433_vm0, %v1435_v23, %v1431_v38  ;;  %v1079_v20 = vmul.f32 %v2001_v39, %v2824_v16  ;;  %2004 = vpow2.f32 %v1821_v9  ;;  %v2865_v1 = vadd.f32 %v2636_v19, %v2795_v61 }
 0x140   : > { %1532 = vst.msk [vmem:[%s2305_s10 + $0x38] sm:$0xf] %vm1517_vm9, %v1499_v3  ;;  %v1483_v10 = vmul.f32 %v1436_v21, %v2740_v24  ;;  %v1507_v52 = vpack.c.bf16 %v1475_v8, %v1475_v8  ;;  %v1089_v29 = vand.u32 2147483648, %v2824_v16  ;;  %vm1084_vm1 = vweird.f32 %v2001_v39 }
 0x141   : > { %v1080_v22 = vsub.f32 1.0, %v1079_v20  ;;  %v1087_v12 = vand.u32 2147483647, %v2824_v16  ;;  %v1829_v30 = vmul.f32 -1.442695, %v2865_v1  ;;  %vm1083_vm2 = vweird.f32 %v2824_v16 }
 0x142   : > { %v1515_v28 = vpack.c.bf16 %v1483_v10, %v1483_v10  ;;  %1540 = vst.msk [vmem:[%s2305_s10 + $0x58] sm:$0xf] %vm1517_vm9, %v1507_v52  ;;  %vm1085_vm4 = vmor %vm1083_vm2, %vm1084_vm1  ;;  %v1090_v61 = vor.u32 1.1754944e-38, %v1089_v29  ;;  %v1209_v13 = vand.u32 2147483648, %v956_v14  ;;  %v1207_v41 = vand.u32 2147483647, %v956_v14 }
 0x143   : > { %v2003_v54 = vpop.eup %2002  ;;  %v1081_v27 = vmul.f32 %v2001_v39, %v1080_v22  ;;  %2006 = vpow2.f32 %v1829_v30  ;;  %vm1088_vm5 = vcmp.eq.f32.partialorder %v1087_v12, 8.507059e+37  ;;  %vm1203_vm6 = vweird.f32 %v956_v14 }
 0x144   : > { %1548 = vst.msk [vmem:[%s2305_s10 + $0x78] sm:$0xf] %vm1517_vm9, %v1515_v28  ;;  %v1199_v24 = vmul.f32 %v2003_v54, %v956_v14  ;;  %vm1204_vm3 = vweird.f32 %v2003_v54  ;;  %v1210_v33 = vor.u32 1.1754944e-38, %v1209_v13  ;;  %vm1208_vm8 = vcmp.eq.f32.partialorder %v1207_v41, 8.507059e+37 }
 0x145   : > { %v1082_v31 = vadd.f32 %v2001_v39, %v1081_v27  ;;  %v2005_v19 = vpop.eup %2004  ;;  %vm1205_vm7 = vmor %vm1203_vm6, %vm1204_vm3 }
 0x146   : > { %v1200_v11 = vsub.f32 1.0, %v1199_v24  ;;  %v964_v37 = vadd.f32 1.0, %v2005_v19 }
 0x147   : > { %v1086_v62 = vsel %vm1085_vm4, %v2001_v39, %v1082_v31 }
 0x148   : > { %v1091_v36 = vsel %vm1088_vm5, %v1090_v61, %v1086_v62  ;;  %v1201_v49 = vmul.f32 %v2003_v54, %v1200_v11  ;;  %2008 = vrcp.f32 %v964_v37  ;;  %v1329_v59 = vand.u32 2147483648, %v964_v37 }
 0x149   : > { %v1460_v18 = vmul.f32 %v1091_v36, %v2743_v34  ;;  %v2007_v16 = vpop.eup %2006  ;;  %v1327_v63 = vand.u32 2147483647, %v964_v37  ;;  %vm1323_vm11 = vweird.f32 %v964_v37 }
 0x14a   : > { %v1202_v45 = vadd.f32 %v2003_v54, %v1201_v49  ;;  %v972_v2 = vadd.f32 1.0, %v2007_v16  ;;  %v1330_v47 = vor.u32 1.1754944e-38, %v1329_v59 }
 0x14b   : > { %v1492_v17 = vpack.c.bf16 %v1460_v18, %v1460_v18  ;;  %vm1328_vm13 = vcmp.eq.f32.partialorder %v1327_v63, 8.507059e+37 }
 0x14c   : > { %v1206_v44 = vsel %vm1205_vm7, %v2003_v54, %v1202_v45  ;;  %2010 = vrcp.f32 %v972_v2  ;;  %v1449_v57 = vand.u32 2147483648, %v972_v2  ;;  %v1447_v42 = vand.u32 2147483647, %v972_v2 }
 0x14d   : > { %1525 = vst.msk [vmem:[%s2305_s10 + $0x1c] sm:$0xf] %vm1517_vm9, %v1492_v17  ;;  %v1211_v35 = vsel %vm1208_vm8, %v1210_v33, %v1206_v44  ;;  %vm1443_vm15 = vweird.f32 %v972_v2 }
 0x14e   : > { %v1468_v58 = vmul.f32 %v1211_v35, %v2751_v7  ;;  %v2009_v40 = vpop.eup %2008  ;;  %v1450_v15 = vor.u32 1.1754944e-38, %v1449_v57  ;;  %vm1448_vm1 = vcmp.eq.f32.partialorder %v1447_v42, 8.507059e+37 }
 0x14f   : > { %v1319_v34 = vmul.f32 %v2009_v40, %v964_v37  ;;  %vm1324_vm10 = vweird.f32 %v2009_v40 }
 0x150   : > { %v1500_v46 = vpack.c.bf16 %v1468_v58, %v1468_v58  ;;  %vm1325_vm12 = vmor %vm1323_vm11, %vm1324_vm10 }
 0x151   : > { %v1320_v32 = vsub.f32 1.0, %v1319_v34 }
 0x152   : > { %1533 = vst.msk [vmem:[%s2305_s10 + $0x3c] sm:$0xf] %vm1517_vm9, %v1500_v46  ;;  %v2011_v60 = vpop.eup %2010 }
 0x153   : > { %v1321_v51 = vmul.f32 %v2009_v40, %v1320_v32  ;;  %v1439_v0 = vmul.f32 %v2011_v60, %v972_v2  ;;  %vm1444_vm14 = vweird.f32 %v2011_v60 }
 0x154   : > { %vm1445_vm0 = vmor %vm1443_vm15, %vm1444_vm14 }
 0x155   : > { %v1322_v53 = vadd.f32 %v2009_v40, %v1321_v51  ;;  %v1440_v4 = vsub.f32 1.0, %v1439_v0 }
 0x157   : > { %v1326_v7 = vsel %vm1325_vm12, %v2009_v40, %v1322_v53  ;;  %v1441_v55 = vmul.f32 %v2011_v60, %v1440_v4 }
 0x158   : > { %v1331_v5 = vsel %vm1328_vm13, %v1330_v47, %v1326_v7 }
 0x159   : > { %v1476_v56 = vmul.f32 %v1331_v5, %v2780_v50  ;;  %v1442_v48 = vadd.f32 %v2011_v60, %v1441_v55 }
 0x15b   : > { %v1508_v14 = vpack.c.bf16 %v1476_v56, %v1476_v56  ;;  %v1446_v6 = vsel %vm1445_vm0, %v2011_v60, %v1442_v48 }
 0x15c   : > { %v1451_v43 = vsel %vm1448_vm1, %v1450_v15, %v1446_v6 }
 0x15d   : > { %1541 = vst.msk [vmem:[%s2305_s10 + $0x5c] sm:$0xf] %vm1517_vm9, %v1508_v14  ;;  %v1484_v9 = vmul.f32 %v1451_v43, %v2865_v1 }
 0x15f   : > { %v1516_v3 = vpack.c.bf16 %v1484_v9, %v1484_v9 }
 0x161   : > { %1549 = vst.msk [vmem:[%s2305_s10 + $0x7c] sm:$0xf] %vm1517_vm9, %v1516_v3 }
 0x162 PF: > { %s14_s17 = sadd.s32 1, %s2036_s17   ;;  %s2941_s15 = smov %s2032_s16 }
 0x163   : > { %p11_p5 = scmp.ge.s32.totalorder %s14_s17, 6   ;;  %s2942_s16 = smov %s2944_s18 }
 0x165   :  { %13 = sbr.rel (!%p11_p5) target bundleno = 2 (0x2), region = 83 }

</bundles_post_ra>
